<compile_context>
chip_gen: v7x
topology: tpu7x:2x2x1
jax: 0.10.0
libtpu: 0.0.40
codegen_flags: <defaults>
</compile_context>

<pallas_src>
import functools

import jax
import jax.numpy as jnp
from jax.experimental import pallas as pl
from jax.experimental.pallas import tpu as pltpu

_EPS = 1e-5


# ---------------------------------------------------------------------------
# Kernel
# ---------------------------------------------------------------------------
def _topo_encoder_kernel(n_layers, kpack, n_valid, kpts_ref, *refs):
    """refs = (w0, b0, w1, b1, ..., w_{L-1}, b_{L-1}, out_ref).

    kpts_ref : (TB, N_pad, 64)              channels-last input tile
    w_i      : (kpack*C_in_i, kpack*C_out_i) block-diagonal when kpack > 1
    b_i      : (1, C_out_i)
    out_ref  : (TB, feature_dim, N_pad)     channels-first (PyTorch NCL) tile
    """
    out_ref = refs[2 * n_layers]

    x = kpts_ref[...].astype(jnp.float32)            # (TB, N_pad, C0)
    tb, n_pad, _ = x.shape
    m = tb * n_pad
    inv_n = 1.0 / float(n_valid)
    # Leading-axis merge only; minor-dim layout unchanged (free).
    x = x.reshape(m, x.shape[-1])

    for i in range(n_layers):
        w = refs[2 * i][...].astype(jnp.float32)       # (p*C_in, p*C_out)
        b = refs[2 * i + 1][...].astype(jnp.float32)   # (1, C_out)
        c_out = w.shape[1] // kpack

        if kpack > 1:
            # Block-diagonal K-packing: fold `kpack` consecutive rows into the
            # lane axis so the MXU contraction depth is kpack*C_in instead of
            # C_in (weights were pre-replicated block-diagonally in the
            # wrapper).  Result rows unpack back in row-major order.
            # TODO(synk): verify the reshapes stay lane shuffles (see header).
            xp = x.reshape(m // kpack, w.shape[0])
            x = jnp.dot(xp, w, preferred_element_type=jnp.float32)
            x = x.reshape(m, c_out) + b
        else:
            # Conv1d(kernel_size=1, bias=True) == x @ W + b (channels-last).
            x = jnp.dot(x, w, preferred_element_type=jnp.float32) + b

        if i < n_layers - 1:
            # One-pass InstanceNorm1d over the sequence axis (biased variance,
            # no affine), statistics over the valid N rows only; centering
            # fused into a single scale+shift, then ReLU.
            xb = x.reshape(tb, n_pad, c_out)
            xv = xb if n_valid == n_pad else xb[:, :n_valid, :]
            s1 = jnp.sum(xv, axis=1, keepdims=True)          # (TB, 1, C)
            s2 = jnp.sum(xv * xv, axis=1, keepdims=True)     # (TB, 1, C)
            mean = s1 * inv_n
            var = s2 * inv_n - mean * mean
            scale = jax.lax.rsqrt(var + _EPS)
            shift = -mean * scale
            xb = jnp.maximum(xb * scale + shift, 0.0)        # ReLU
            x = xb.reshape(m, c_out)

    y = x.reshape(tb, n_pad, x.shape[-1])                    # (TB, N_pad, F)
    # Transpose in-kernel (XLU slot, otherwise idle) so the HBM store is
    # lane-dense over N and matches PyTorch's (B, F, N) with no wrapper
    # transpose (no extra HBM round trip of the output).
    out_ref[...] = jnp.swapaxes(y, 1, 2).astype(out_ref.dtype)


# ---------------------------------------------------------------------------
# Tiling / generation-aware configuration
# ---------------------------------------------------------------------------
def _round_up(x, m):
    return -(-x // m) * m


def _tpu_config():
    """Returns (vmem_budget_bytes, vmem_limit_bytes_or_None, num_tensorcores)."""
    budget, limit, cores = 12 << 20, None, 2          # safe fallback (any chip)
    try:
        kind = jax.devices()[0].device_kind.lower()
    except Exception:
        kind = ""
    if "v7" in kind:                                  # 64 MiB VMEM, 2 TCs/chip
        budget, limit, cores = 24 << 20, 44 << 20, 2
    elif "v6" in kind:                                # 128 MiB VMEM, 1 TC
        budget, limit, cores = 48 << 20, 96 << 20, 1
    elif "v5 lite" in kind or "v5e" in kind or "v5lite" in kind:
        budget, limit, cores = 48 << 20, 96 << 20, 1  # 128 MiB VMEM, 1 TC
    elif "v5p" in kind or "v5" in kind or "v4" in kind:
        budget, limit, cores = 48 << 20, 96 << 20, 2  # megacore: 2 TCs/device
    elif "v2" in kind or "v3" in kind:
        budget, limit, cores = 8 << 20, None, 1
    # Refine from the runtime-reported VMEM capacity when available.
    try:
        cap = getattr(pltpu.get_tpu_info(), "vmem_capacity_bytes", None)
        if cap:
            budget = min(budget, int(cap) * 3 // 8)
            limit = min(limit, int(cap) * 3 // 4) if limit is not None else None
    except Exception:
        pass
    return budget, limit, cores


def _est_vmem_bytes(tb, n_pad, channels, in_bytes, out_bytes, param_bytes):
    """Conservative per-step VMEM estimate: double-buffered I/O tiles, live f32
    activations (current + next layer + pre/post-transpose output copy),
    double-buffered params, plus Mosaic internal scratch headroom."""
    c0, f = channels[0], channels[-1]
    max_c = max(channels)
    act = 4 * tb * n_pad * (2 * max_c + 2 * f)
    io = tb * n_pad * (2 * c0 * in_bytes + 2 * f * out_bytes)
    return act + io + 2 * param_bytes + (2 << 20)


def _choose_batch_tile(batch, n_pad, channels, in_bytes, out_bytes,
                       param_bytes, budget_bytes, num_cores):
    """Largest batch tile that fits the generation-aware VMEM budget; on
    multi-TensorCore chips the grid is additionally rounded to a multiple of
    the core count so both cores get equal work."""
    def fits(t):
        return _est_vmem_bytes(t, n_pad, channels, in_bytes, out_bytes,
                               param_bytes) <= budget_bytes

    tb = 1
    for cand in range(1, batch + 1):
        if fits(cand):
            tb = cand
        else:
            break
    if num_cores >= 2 and batch > 1:
        grid = pl.cdiv(batch, tb)
        grid = _round_up(max(grid, num_cores), num_cores)
        tb = pl.cdiv(batch, grid)
    return max(tb, 1)


# ---------------------------------------------------------------------------
# Wrapper
# ---------------------------------------------------------------------------
def topo_encoder_forward(kpts, weights, biases, *, kpack=1):
    """kpts: (B, N, 64).  Returns (B, feature_dim, N), dtype = kpts.dtype.

    Pass bf16 kpts to halve HBM I/O (all math stays f32 in-kernel); keep f32
    for tight parity with the f32 PyTorch module.  kpack in {1, 2, 4} enables
    block-diagonal K-packing of the skinny matmuls (off by default, see TODO).
    """
    B, N, c0 = kpts.shape
    n_layers = len(weights)
    assert c0 == weights[0].shape[0]
    feature_dim = weights[-1].shape[1]
    channels = [c0] + [w.shape[1] for w in weights]

    # Pad N so the transposed (TB, F, N) output store is lane-dense/unmasked.
    lane = 128 if N >= 128 else 8
    n_pad = _round_up(N, lane)

    if kpack > 1 and n_pad % kpack != 0:
        kpack = 1
    kq = max(kpack, 1)

    budget, vmem_limit, num_cores = _tpu_config()
    in_bytes = jnp.dtype(kpts.dtype).itemsize
    out_bytes = in_bytes
    param_bytes = sum(int(w.size) * kq * kq + int(b.size)
                      for w, b in zip(weights, biases)) * 4

    tb = _choose_batch_tile(B, n_pad, channels, in_bytes, out_bytes,
                            param_bytes, budget, num_cores)
    grid = pl.cdiv(B, tb)
    b_pad = grid * tb

    x = kpts
    if b_pad != B or n_pad != N:
        x = jnp.pad(x, ((0, b_pad - B), (0, n_pad - N), (0, 0)))

    # Interleave params: w0, b0, w1, b1, ...
    params = []
    in_specs = [pl.BlockSpec((tb, n_pad, c0), lambda b: (b, 0, 0))]
    for w, bias in zip(weights, biases):
        if kpack > 1:
            # Block-diagonal replication fills kpack*C_in of the MXU K depth.
            w = jnp.kron(jnp.eye(kpack, dtype=w.dtype), w)
        params.append(w)
        params.append(bias.reshape(1, -1))
        # Constant index_map: same block every grid step -> stays VMEM-resident.
        in_specs.append(pl.BlockSpec(w.shape, lambda b: (0, 0)))
        in_specs.append(pl.BlockSpec((1, bias.shape[-1]), lambda b: (0, 0)))

    compiler_kwargs = dict(dimension_semantics=("parallel",))
    if vmem_limit is not None:
        compiler_kwargs["vmem_limit_bytes"] = int(vmem_limit)

    out = pl.pallas_call(
        functools.partial(_topo_encoder_kernel, n_layers, kpack, N),
        grid=(grid,),
        in_specs=in_specs,
        out_specs=pl.BlockSpec((tb, feature_dim, n_pad), lambda b: (b, 0, 0)),
        out_shape=jax.ShapeDtypeStruct((b_pad, feature_dim, n_pad), kpts.dtype),
        compiler_params=pltpu.CompilerParams(**compiler_kwargs),
    )(x, *params)

    if b_pad != B or n_pad != N:
        out = out[:B, :, :N]
    return out


# ---------------------------------------------------------------------------
# Pure-JAX reference (mirrors the PyTorch module) + param init
# ---------------------------------------------------------------------------
def _reference_forward(kpts, weights, biases):
    x = kpts.astype(jnp.float32)  # (B, N, C)
    n_layers = len(weights)
    for i, (w, b) in enumerate(zip(weights, biases)):
        x = jnp.einsum("bnc,cd->bnd", x, w) + b[None, None, :]
        if i < n_layers - 1:
            mean = jnp.mean(x, axis=1, keepdims=True)
            var = jnp.mean((x - mean) ** 2, axis=1, keepdims=True)
            x = (x - mean) / jnp.sqrt(var + _EPS)
            x = jnp.maximum(x, 0.0)
    return jnp.transpose(x, (0, 2, 1))  # (B, F, N)


def init_params(key, channels):
    """channels = [64, *layers, feature_dim].  Weight i stored as
    (C_in, C_out) (PyTorch Conv1d weight (C_out, C_in, 1) transposed/squeezed).
    Last layer bias is 0 (nn.init.constant_)."""
    weights, biases = [], []
    n_layers = len(channels) - 1
    for i in range(n_layers):
        c_in, c_out = channels[i], channels[i + 1]
        key, kw, kb = jax.random.split(key, 3)
        bound = 1.0 / jnp.sqrt(c_in)
        w = jax.random.uniform(kw, (c_in, c_out), jnp.float32, -bound, bound)
        if i == n_layers - 1:
            b = jnp.zeros((c_out,), jnp.float32)
        else:
            b = jax.random.uniform(kb, (c_out,), jnp.float32, -bound, bound)
        weights.append(w)
        biases.append(b)
    return weights, biases


if __name__ == "__main__":
    # Small synthetic config: TopoEncoder(feature_dim=32, layers=[32, 32])
    feature_dim = 32
    hidden_layers = [32, 32]
    channels = [64] + hidden_layers + [feature_dim]

    B, N = 4, 128  # batch, number of keypoints
    key = jax.random.PRNGKey(0)
    key, kx = jax.random.split(key)
    kpts = jax.random.normal(kx, (B, N, 64), jnp.float32)

    weights, biases = init_params(key, channels)

    out = topo_encoder_forward(kpts, weights, biases)
    out = jax.block_until_ready(out)

    ref = _reference_forward(kpts, weights, biases)
    assert out.shape == (B, feature_dim, N), out.shape
    assert jnp.allclose(out, ref, atol=1e-4, rtol=1e-4), (
        float(jnp.max(jnp.abs(out - ref))))

    print("KERNEL_OK")
</pallas_src>

<mosaic_0001>
module attributes {stable_mosaic.version = 11 : i64} {
  func.func @_topo_encoder_kernel(%arg0: i32, %arg1: memref<2x128x64xf32, #tpu.memory_space<vmem>>, %arg2: memref<64x32xf32, #tpu.memory_space<vmem>>, %arg3: memref<1x32xf32, #tpu.memory_space<vmem>>, %arg4: memref<32x32xf32, #tpu.memory_space<vmem>>, %arg5: memref<1x32xf32, #tpu.memory_space<vmem>>, %arg6: memref<32x32xf32, #tpu.memory_space<vmem>>, %arg7: memref<1x32xf32, #tpu.memory_space<vmem>>, %arg8: memref<2x32x128xf32, #tpu.memory_space<vmem>>) attributes {dimension_semantics = [#tpu.dimension_semantics<parallel>], iteration_bounds = array<i64: 2>, scalar_prefetch = 0 : i64, scratch_operands = 0 : i64, tpu.core_type = #tpu.core_type<tc>, window_params = [{transform_indices = @transform_0, window_bounds = array<i64: 2, 128, 64>}, {pipeline_mode = #tpu.pipeline_mode<synchronous>, transform_indices = @transform_1, window_bounds = array<i64: 64, 32>}, {pipeline_mode = #tpu.pipeline_mode<synchronous>, transform_indices = @transform_2, window_bounds = array<i64: 1, 32>}, {pipeline_mode = #tpu.pipeline_mode<synchronous>, transform_indices = @transform_3, window_bounds = array<i64: 32, 32>}, {pipeline_mode = #tpu.pipeline_mode<synchronous>, transform_indices = @transform_4, window_bounds = array<i64: 1, 32>}, {pipeline_mode = #tpu.pipeline_mode<synchronous>, transform_indices = @transform_5, window_bounds = array<i64: 32, 32>}, {pipeline_mode = #tpu.pipeline_mode<synchronous>, transform_indices = @transform_6, window_bounds = array<i64: 1, 32>}, {transform_indices = @transform_7, window_bounds = array<i64: 2, 32, 128>}]} {
    %c0 = arith.constant 0 : index
    %c0_0 = arith.constant 0 : index
    %c0_1 = arith.constant 0 : index
    %0 = vector.load %arg1[%c0, %c0_0, %c0_1] : memref<2x128x64xf32, #tpu.memory_space<vmem>>, vector<2x128x64xf32>
    %1 = vector.shape_cast %0 : vector<2x128x64xf32> to vector<256x64xf32>
    %c0_2 = arith.constant 0 : index
    %c0_3 = arith.constant 0 : index
    %2 = vector.load %arg2[%c0_2, %c0_3] : memref<64x32xf32, #tpu.memory_space<vmem>>, vector<64x32xf32>
    %c0_4 = arith.constant 0 : index
    %c0_5 = arith.constant 0 : index
    %3 = vector.load %arg3[%c0_4, %c0_5] : memref<1x32xf32, #tpu.memory_space<vmem>>, vector<1x32xf32>
    %cst = arith.constant dense<0.000000e+00> : vector<256x32xf32>
    %4 = tpu.matmul %1, %2, %cst {dimension_numbers = #tpu.dot_dimension_numbers<[1], [0], [0], [1], [0, 0, 1, 1], [], []>} : vector<256x64xf32>, vector<64x32xf32>, vector<256x32xf32> -> vector<256x32xf32>
    %5 = vector.broadcast %3 : vector<1x32xf32> to vector<256x32xf32>
    %6 = arith.addf %4, %5 : vector<256x32xf32>
    %7 = vector.shape_cast %6 : vector<256x32xf32> to vector<2x128x32xf32>
    %cst_6 = arith.constant dense<0.000000e+00> : vector<2x32xf32>
    %8 = vector.multi_reduction <add>, %7, %cst_6 [1] : vector<2x128x32xf32> to vector<2x32xf32>
    %9 = vector.shape_cast %8 : vector<2x32xf32> to vector<2x1x32xf32>
    %10 = arith.mulf %7, %7 : vector<2x128x32xf32>
    %cst_7 = arith.constant dense<0.000000e+00> : vector<2x32xf32>
    %11 = vector.multi_reduction <add>, %10, %cst_7 [1] : vector<2x128x32xf32> to vector<2x32xf32>
    %12 = vector.shape_cast %11 : vector<2x32xf32> to vector<2x1x32xf32>
    %cst_8 = arith.constant 7.812500e-03 : f32
    %13 = vector.broadcast %cst_8 : f32 to vector<2x1x32xf32>
    %14 = arith.mulf %9, %13 : vector<2x1x32xf32>
    %cst_9 = arith.constant 7.812500e-03 : f32
    %15 = vector.broadcast %cst_9 : f32 to vector<2x1x32xf32>
    %16 = arith.mulf %12, %15 : vector<2x1x32xf32>
    %17 = arith.mulf %14, %14 : vector<2x1x32xf32>
    %18 = arith.subf %16, %17 : vector<2x1x32xf32>
    %cst_10 = arith.constant 9.99999974E-6 : f32
    %19 = vector.broadcast %cst_10 : f32 to vector<2x1x32xf32>
    %20 = arith.addf %18, %19 : vector<2x1x32xf32>
    %21 = math.rsqrt %20 : vector<2x1x32xf32>
    %cst_11 = arith.constant 0.000000e+00 : f32
    %22 = vector.broadcast %cst_11 : f32 to vector<2x1x32xf32>
    %23 = arith.subf %22, %14 : vector<2x1x32xf32>
    %24 = arith.mulf %23, %21 : vector<2x1x32xf32>
    %25 = vector.broadcast %21 : vector<2x1x32xf32> to vector<2x128x32xf32>
    %26 = arith.mulf %7, %25 : vector<2x128x32xf32>
    %27 = vector.broadcast %24 : vector<2x1x32xf32> to vector<2x128x32xf32>
    %28 = arith.addf %26, %27 : vector<2x128x32xf32>
    %cst_12 = arith.constant 0.000000e+00 : f32
    %29 = vector.broadcast %cst_12 : f32 to vector<2x128x32xf32>
    %30 = arith.maximumf %28, %29 : vector<2x128x32xf32>
    %31 = vector.shape_cast %30 : vector<2x128x32xf32> to vector<256x32xf32>
    %c0_13 = arith.constant 0 : index
    %c0_14 = arith.constant 0 : index
    %32 = vector.load %arg4[%c0_13, %c0_14] : memref<32x32xf32, #tpu.memory_space<vmem>>, vector<32x32xf32>
    %c0_15 = arith.constant 0 : index
    %c0_16 = arith.constant 0 : index
    %33 = vector.load %arg5[%c0_15, %c0_16] : memref<1x32xf32, #tpu.memory_space<vmem>>, vector<1x32xf32>
    %cst_17 = arith.constant dense<0.000000e+00> : vector<256x32xf32>
    %34 = tpu.matmul %31, %32, %cst_17 {dimension_numbers = #tpu.dot_dimension_numbers<[1], [0], [0], [1], [0, 0, 1, 1], [], []>} : vector<256x32xf32>, vector<32x32xf32>, vector<256x32xf32> -> vector<256x32xf32>
    %35 = vector.broadcast %33 : vector<1x32xf32> to vector<256x32xf32>
    %36 = arith.addf %34, %35 : vector<256x32xf32>
    %37 = vector.shape_cast %36 : vector<256x32xf32> to vector<2x128x32xf32>
    %cst_18 = arith.constant dense<0.000000e+00> : vector<2x32xf32>
    %38 = vector.multi_reduction <add>, %37, %cst_18 [1] : vector<2x128x32xf32> to vector<2x32xf32>
    %39 = vector.shape_cast %38 : vector<2x32xf32> to vector<2x1x32xf32>
    %40 = arith.mulf %37, %37 : vector<2x128x32xf32>
    %cst_19 = arith.constant dense<0.000000e+00> : vector<2x32xf32>
    %41 = vector.multi_reduction <add>, %40, %cst_19 [1] : vector<2x128x32xf32> to vector<2x32xf32>
    %42 = vector.shape_cast %41 : vector<2x32xf32> to vector<2x1x32xf32>
    %cst_20 = arith.constant 7.812500e-03 : f32
    %43 = vector.broadcast %cst_20 : f32 to vector<2x1x32xf32>
    %44 = arith.mulf %39, %43 : vector<2x1x32xf32>
    %cst_21 = arith.constant 7.812500e-03 : f32
    %45 = vector.broadcast %cst_21 : f32 to vector<2x1x32xf32>
    %46 = arith.mulf %42, %45 : vector<2x1x32xf32>
    %47 = arith.mulf %44, %44 : vector<2x1x32xf32>
    %48 = arith.subf %46, %47 : vector<2x1x32xf32>
    %cst_22 = arith.constant 9.99999974E-6 : f32
    %49 = vector.broadcast %cst_22 : f32 to vector<2x1x32xf32>
    %50 = arith.addf %48, %49 : vector<2x1x32xf32>
    %51 = math.rsqrt %50 : vector<2x1x32xf32>
    %cst_23 = arith.constant 0.000000e+00 : f32
    %52 = vector.broadcast %cst_23 : f32 to vector<2x1x32xf32>
    %53 = arith.subf %52, %44 : vector<2x1x32xf32>
    %54 = arith.mulf %53, %51 : vector<2x1x32xf32>
    %55 = vector.broadcast %51 : vector<2x1x32xf32> to vector<2x128x32xf32>
    %56 = arith.mulf %37, %55 : vector<2x128x32xf32>
    %57 = vector.broadcast %54 : vector<2x1x32xf32> to vector<2x128x32xf32>
    %58 = arith.addf %56, %57 : vector<2x128x32xf32>
    %cst_24 = arith.constant 0.000000e+00 : f32
    %59 = vector.broadcast %cst_24 : f32 to vector<2x128x32xf32>
    %60 = arith.maximumf %58, %59 : vector<2x128x32xf32>
    %61 = vector.shape_cast %60 : vector<2x128x32xf32> to vector<256x32xf32>
    %c0_25 = arith.constant 0 : index
    %c0_26 = arith.constant 0 : index
    %62 = vector.load %arg6[%c0_25, %c0_26] : memref<32x32xf32, #tpu.memory_space<vmem>>, vector<32x32xf32>
    %c0_27 = arith.constant 0 : index
    %c0_28 = arith.constant 0 : index
    %63 = vector.load %arg7[%c0_27, %c0_28] : memref<1x32xf32, #tpu.memory_space<vmem>>, vector<1x32xf32>
    %cst_29 = arith.constant dense<0.000000e+00> : vector<256x32xf32>
    %64 = tpu.matmul %61, %62, %cst_29 {dimension_numbers = #tpu.dot_dimension_numbers<[1], [0], [0], [1], [0, 0, 1, 1], [], []>} : vector<256x32xf32>, vector<32x32xf32>, vector<256x32xf32> -> vector<256x32xf32>
    %65 = vector.broadcast %63 : vector<1x32xf32> to vector<256x32xf32>
    %66 = arith.addf %64, %65 : vector<256x32xf32>
    %67 = vector.shape_cast %66 : vector<256x32xf32> to vector<2x128x32xf32>
    %68 = tpu.transpose %67, [0, 2, 1] : vector<2x128x32xf32> -> vector<2x32x128xf32>
    %c0_30 = arith.constant 0 : index
    %c0_31 = arith.constant 0 : index
    %c0_32 = arith.constant 0 : index
    %69 = vector.load %arg8[%c0_30, %c0_31, %c0_32] : memref<2x32x128xf32, #tpu.memory_space<vmem>>, vector<2x32x128xf32>
    tpu.vector_store %arg8[%c0_30, %c0_31, %c0_32], %68 {strides = array<i32>} : memref<2x32x128xf32, #tpu.memory_space<vmem>>, vector<2x32x128xf32>,
    return
  }
  func.func @transform_0(%arg0: i32) -> (i32, i32, i32) {
    %c0_i32 = arith.constant 0 : i32
    %c0_i32_0 = arith.constant 0 : i32
    %c0_i32_1 = arith.constant 0 : i32
    return %arg0, %c0_i32, %c0_i32_0 : i32, i32, i32
  }
  func.func @transform_1(%arg0: i32) -> (i32, i32) {
    %c0_i32 = arith.constant 0 : i32
    %c0_i32_0 = arith.constant 0 : i32
    %c0_i32_1 = arith.constant 0 : i32
    return %c0_i32, %c0_i32_0 : i32, i32
  }
  func.func @transform_2(%arg0: i32) -> (i32, i32) {
    %c0_i32 = arith.constant 0 : i32
    %c0_i32_0 = arith.constant 0 : i32
    %c0_i32_1 = arith.constant 0 : i32
    return %c0_i32, %c0_i32_0 : i32, i32
  }
  func.func @transform_3(%arg0: i32) -> (i32, i32) {
    %c0_i32 = arith.constant 0 : i32
    %c0_i32_0 = arith.constant 0 : i32
    %c0_i32_1 = arith.constant 0 : i32
    return %c0_i32, %c0_i32_0 : i32, i32
  }
  func.func @transform_4(%arg0: i32) -> (i32, i32) {
    %c0_i32 = arith.constant 0 : i32
    %c0_i32_0 = arith.constant 0 : i32
    %c0_i32_1 = arith.constant 0 : i32
    return %c0_i32, %c0_i32_0 : i32, i32
  }
  func.func @transform_5(%arg0: i32) -> (i32, i32) {
    %c0_i32 = arith.constant 0 : i32
    %c0_i32_0 = arith.constant 0 : i32
    %c0_i32_1 = arith.constant 0 : i32
    return %c0_i32, %c0_i32_0 : i32, i32
  }
  func.func @transform_6(%arg0: i32) -> (i32, i32) {
    %c0_i32 = arith.constant 0 : i32
    %c0_i32_0 = arith.constant 0 : i32
    %c0_i32_1 = arith.constant 0 : i32
    return %c0_i32, %c0_i32_0 : i32, i32
  }
  func.func @transform_7(%arg0: i32) -> (i32, i32, i32) {
    %c0_i32 = arith.constant 0 : i32
    %c0_i32_0 = arith.constant 0 : i32
    %c0_i32_1 = arith.constant 0 : i32
    return %arg0, %c0_i32, %c0_i32_0 : i32, i32, i32
  }
}

</mosaic_0001>

<bundles_post_ra>
// kernel: tpu_custom_call.1
= control target key start
LH: loop header
LB: loop body
LE: loop exit
PB: predicated region body
PF: predicated region fallthrough
CT: control target
= control target key end

     0   :  { %12 = vsyncpa [#allocation3], 0  ;;  %s3586_s0 = inlined_call_operand.vmem [shape: f32[4,128,64], index: 0, kind: input, shape index: {}]   ;;  %s3587_s1 = inlined_call_operand.vmem [shape: f32[64,32], index: 1, kind: input, shape index: {}]   ;;  %s3588_s2 = inlined_call_operand.vmem [shape: f32[1,32], index: 2, kind: input, shape index: {}]   ;;  %s3589_s3 = inlined_call_operand.vmem [shape: f32[32,32], index: 3, kind: input, shape index: {}]   ;;  %s3590_s4 = inlined_call_operand.vmem [shape: f32[1,32], index: 4, kind: input, shape index: {}]   ;;  %s3591_s5 = inlined_call_operand.vmem [shape: f32[32,32], index: 5, kind: input, shape index: {}]   ;;  %s3592_s6 = inlined_call_operand.vmem [shape: f32[1,32], index: 6, kind: input, shape index: {}]   ;;  %s3593_s7 = inlined_call_operand.hbm [shape: f32[4,32,128], index: 7, kind: output, shape index: {}]  }
   0x1   :  { %14 = vsyncpa [#allocation3 + $0x1], 0  ;;  %s2646_s24 = smov 0   ;;  %s2648_s25 = smov 0  }
   0x2   :  { %s2650_s26 = smov 0   ;;  %s2652_s27 = smov 0  }
   0x3 LB: > { %s2667_s28 = sadd.s32 4294967295, %s2601_s27   ;;  %s2050_s29 = sadd.s32 4294967294, %s2601_s27   ;;  %s2601_s27 = sphi %s2652_s27, %s3599_s27   ;;  %s2597_s26 = sphi %s2650_s26, %s3598_s26   ;;  %s2593_s25 = sphi %s2648_s25, %s3597_s25   ;;  %s2589_s24 = sphi %s2646_s24, %s3596_s24  }
   0x4   : > { %s2671_s30 = sadd.s32 1, %s2601_s27   ;;  %s179_s8 = sadd.s32 1, %s2597_s26 }
   0x5   : > { %s176_s9 = ssub.s32 %s2601_s27, %s2671_s30  ;;  %p189_p0 = scmp.ne.s32.totalorder %s2597_s26, %s2593_s25 }
   0x6   : > { %p177_p1 = scmp.eq.s32.totalorder %s176_s9, 0  ;;  %p190_p2 = scmp.eq.s32.totalorder %s2667_s28, 1 }
   0x7   : > { %p195_p3 = scmp.ne.s32.totalorder %s2593_s25, %s2589_s24  ;;  %p196_p4 = scmp.eq.s32.totalorder %s2050_s29, 1 }
   0x8   : > { %s2682_s10 = scalar_select %p177_p1, %s2597_s26, %s179_s8  }
   0x9   : > { %p2684_p5 = por %p190_p2, %p189_p0  ;;  %p2688_p6 = por %p196_p4, %p195_p3 }
   0xa   : > { %p2053_p7 = scmp.ge.s32.totalorder %s2601_s27, 1  ;;  %p242_p8 = scmp.lt.s32.totalorder %s2601_s27, 3 }
   0xc   : > { %p243_p9 = pnand %p2053_p7, %p242_p8 }
   0xd   : > { %v315_v0 = vld [vmem:[%s3587_s1] sm:$0xff] (!%p243_p9)  ;;  %v316_v1 = vld [vmem:[%s3587_s1 + $0x8] sm:$0xff] (!%p243_p9)  ;;  %v317_v2 = vld [vmem:[%s3587_s1 + $0x10] sm:$0xff] (!%p243_p9)  ;;  %s2055_s19 = sshll.u32 (!%p243_p9), %s2667_s28, 1  ;;  %vm330_vm0 = vcmask (!%p243_p9), 523264   ;;  %vm652_vm1 = vcmask (!%p243_p9), 261120  }
   0xe   : > { %246 = sbr.rel (%p243_p9) target bundleno = 1009 (0x3f1), region = 48  ;;  %v2454_v3 = vpack.c.bf16 (!%p243_p9), %v316_v1, %v315_v0  ;;  %v318_v4 = vld [vmem:[%s3587_s1 + $0x18] sm:$0xff] (!%p243_p9)  ;;  %p276_p10 = scmp.lt.s32.totalorder (!%p243_p9), %s2055_s19, 3  ;;  %v319_v6 = vld [vmem:[%s3587_s1 + $0x20] sm:$0xff] (!%p243_p9)  ;;  %v320_v7 = vld [vmem:[%s3587_s1 + $0x28] sm:$0xff] (!%p243_p9) }
   0xf   : > { %v2458_v5 = vpack.c.bf16 (!%p243_p9), %v318_v4, %v317_v2  ;;  %v2462_v8 = vpack.c.bf16 (!%p243_p9), %v320_v7, %v319_v6  ;;  %v321_v9 = vld [vmem:[%s3587_s1 + $0x30] sm:$0xff] (!%p243_p9)  ;;  %v322_v10 = vld [vmem:[%s3587_s1 + $0x38] sm:$0xff] (!%p243_p9)  ;;  %v945_v44 = vld [vmem:[%s3589_s3] sm:$0xff] (!%p243_p9)  ;;  %s272_s14 = sand.u32 (!%p243_p9), 1, %s2593_s25   ;;  %s2165_s18 = sshll.u32 (!%p243_p9), %s2667_s28, 10 }
  0x10   : > { %2455 = vmatprep.subr.bf16.mxu0 (!%p243_p9), %v2454_v3  ;;  %v2466_v12 = vpack.c.bf16 (!%p243_p9), %v322_v10, %v321_v9  ;;  %v946_v45 = vld [vmem:[%s3589_s3 + $0x8] sm:$0xff] (!%p243_p9)  ;;  %v947_v47 = vld [vmem:[%s3589_s3 + $0x10] sm:$0xff] (!%p243_p9)  ;;  %v948_v48 = vld [vmem:[%s3589_s3 + $0x18] sm:$0xff] (!%p243_p9)  ;;  %s2054_s15 = sshll.u32 (!%p243_p9), %s272_s14, 6  ;;  %s3543_s21 = scalar_lea.hbm (!%p243_p9), %s3593_s7, %s2165_s18 }
  0x11   : > { %2457 = vmatpush3.bf16.msra.mxu0 (!%p243_p9), %v2454_v3  ;;  %v2470_v46 = vpack.c.bf16 (!%p243_p9), %v946_v45, %v945_v44  ;;  %v2474_v49 = vpack.c.bf16 (!%p243_p9), %v948_v48, %v947_v47  ;;  %v2803_v50 = vld [vmem:[%s3588_s2] ss:$0 sm:$0xff] (!%p243_p9)  ;;  %s274_s16 = scalar_lea.vmem (!%p243_p9), [#allocation2], %s2054_s15  ;;  %s3545_s22 = scalar_lea.sflag (!%p243_p9), [#allocation3], %s272_s14 }
  0x12   : > { %2459 = vmatprep.subr.bf16.mxu0 (!%p243_p9), %v2458_v5  ;;  %s1988_s17 = sshll.u32 (!%p243_p9), %s274_s16, 4  ;;  %s2603_s28 = smov (!%p243_p9), [#allocation2]   ;;  %s3538_s17 = int_to_ptr.vmem [resolvable:$true] %s1988_s17 }
  0x13   : > { %2486 = vmatprep.subr.bf16.mxu1 (!%p243_p9), %v2470_v46  ;;  %s2539_s23 = scalar_lea.vmem (!%p243_p9), %s3538_s17, 1024  ;;  %s2543_s29 = sshll.u32 (!%p243_p9), %s2603_s28, 4  ;;  %s2544_s29 = int_to_ptr.vmem [resolvable:$false] %s2543_s29 }
  0x14   : > { %2488 = vmatpush3.bf16.msra.mxu1 (!%p243_p9), %v2470_v46  ;;  %p2540_p11 = scmp.ne.s32.totalorder (!%p243_p9), %s3538_s17, %s2539_s23  ;;  %s2545_s8 = scalar_lea.vmem (!%p243_p9), %s2544_s29, 2048 }
  0x15   : > { %s3601_s19 = smov (!%p276_p10, %s2055_s19), 3  ;;  %2461 = vmatpush3.bf16.msra.mxu0 %v2458_v5  ;;  %2487 = vmatprep.subr.bf16.mxu1 %v2474_v49  ;;  %p2546_p0 = scmp.lt.s32.totalorder %s3538_s17, %s2544_s29 }
  0x16   : > { %s2163_s9 = sshll.u32 %s3601_s19, 7  ;;  %2463 = vmatprep.subr.bf16.mxu0 %v2462_v8  ;;  %p2541_p12 = pnand %p2540_p11, %p2684_p5 }
  0x17   : > { %s2722_s20 = scalar_lea.vmem %s3586_s0, %s2163_s9  ;;  %p2547_p1 = scmp.lt.s32.totalorder %s2545_s8, %s2539_s23 }
  0x18   : > { %v283_v11 = vld [vmem:[%s2722_s20] sm:$0xff]  ;;  %v284_v13 = vld [vmem:[%s2722_s20 + $0x8] sm:$0xff]  ;;  %v285_v14 = vld [vmem:[%s2722_s20 + $0x10] sm:$0xff]  ;;  %2489 = vmatpush3.bf16.msra.mxu1 %v2474_v49  ;;  %p2542_p13 = pneg %p2541_p12 }
  0x19   : > { %2294 = vmatprep.mubr.msk.f32.mxu0 %vm330_vm0, %v283_v11  ;;  %2465 = vmatpush3.bf16.msra.mxu0 %v2462_v8  ;;  %v286_v15 = vld [vmem:[%s2722_s20 + $0x18] sm:$0xff]  ;;  %v287_v16 = vld [vmem:[%s2722_s20 + $0x20] sm:$0xff]  ;;  %v288_v17 = vld [vmem:[%s2722_s20 + $0x28] sm:$0xff]  ;;  %p2548_p2 = por %p2547_p1, %p2546_p0 }
  0x1a   : > { %2467 = vmatprep.subr.bf16.mxu0 %v2466_v12  ;;  %v289_v18 = vld [vmem:[%s2722_s20 + $0x30] sm:$0xff]  ;;  %v290_v19 = vld [vmem:[%s2722_s20 + $0x38] sm:$0xff]  ;;  %v291_v20 = vld [vmem:[%s2722_s20 + $0x40] sm:$0xff] }
  0x1b   : > { %v292_v21 = vld [vmem:[%s2722_s20 + $0x48] sm:$0xff]  ;;  %v293_v22 = vld [vmem:[%s2722_s20 + $0x50] sm:$0xff]  ;;  %v294_v23 = vld [vmem:[%s2722_s20 + $0x58] sm:$0xff]  ;;  %p2549_p3 = pnand %p2548_p2, %p2542_p13 }
  0x1c   : > { %v295_v24 = vld [vmem:[%s2722_s20 + $0x60] sm:$0xff]  ;;  %v296_v25 = vld [vmem:[%s2722_s20 + $0x68] sm:$0xff]  ;;  %v297_v26 = vld [vmem:[%s2722_s20 + $0x70] sm:$0xff] }
  0x1d   : > { %2469 = vmatpush3.bf16.msra.mxu0 %v2466_v12  ;;  %v298_v27 = vld [vmem:[%s2722_s20 + $0x78] sm:$0xff]  ;;  %v299_v28 = vld [vmem:[%s2722_s20 + $0x80] sm:$0xff]  ;;  %v300_v29 = vld [vmem:[%s2722_s20 + $0x88] sm:$0xff] }
  0x1e   : > { %v301_v30 = vld [vmem:[%s2722_s20 + $0x90] sm:$0xff]  ;;  %v302_v31 = vld [vmem:[%s2722_s20 + $0x98] sm:$0xff]  ;;  %v303_v32 = vld [vmem:[%s2722_s20 + $0xa0] sm:$0xff]  ;;  %2471 = vmatprep.subr.bf16.mxu0 %v2470_v46 }
  0x1f   : > { %v304_v33 = vld [vmem:[%s2722_s20 + $0xa8] sm:$0xff]  ;;  %v305_v34 = vld [vmem:[%s2722_s20 + $0xb0] sm:$0xff]  ;;  %v306_v35 = vld [vmem:[%s2722_s20 + $0xb8] sm:$0xff] }
  0x20   : > { %2295 = vmatmul.mubr.msk.f32.vlgmr.msra.gmra.mrb[0].mxu0 %vm330_vm0, %v284_v13  ;;  %v307_v36 = vld [vmem:[%s2722_s20 + $0xc0] sm:$0xff]  ;;  %v308_v37 = vld [vmem:[%s2722_s20 + $0xc8] sm:$0xff]  ;;  %v309_v38 = vld [vmem:[%s2722_s20 + $0xd0] sm:$0xff] }
  0x21   : > { %2297 = vmatprep.mubr.msk.f32.mxu0 %vm330_vm0, %v285_v14  ;;  %v310_v39 = vld [vmem:[%s2722_s20 + $0xd8] sm:$0xff]  ;;  %v311_v40 = vld [vmem:[%s2722_s20 + $0xe0] sm:$0xff]  ;;  %v312_v41 = vld [vmem:[%s2722_s20 + $0xe8] sm:$0xff]  ;;  %2473 = vmatpush3.bf16.msra.mxu0 %v2470_v46 }
  0x22   : > { %v313_v42 = vld [vmem:[%s2722_s20 + $0xf0] sm:$0xff]  ;;  %v314_v43 = vld [vmem:[%s2722_s20 + $0xf8] sm:$0xff]  ;;  %2475 = vmatprep.subr.bf16.mxu0 %v2474_v49 }
  0x24   : > { %2298 = vmatmul.mubr.msk.f32.gmra.mrb[2].mxu0 %vm330_vm0, %v286_v15 }
  0x25   : > { %2300 = vmatprep.mubr.msk.f32.mxu0 %vm330_vm0, %v287_v16  ;;  %2477 = vmatpush3.bf16.msra.mxu0 %v2474_v49 }
  0x28   : > { %2301 = vmatmul.mubr.msk.f32.gmra.mrb[4].mxu0 %vm330_vm0, %v288_v17 }
  0x29   : > { %2303 = vmatprep.mubr.msk.f32.mxu0 %vm330_vm0, %v289_v18 }
  0x2c   : > { %2304 = vmatmul.mubr.msk.f32.gmra.mrb[6].mxu0 %vm330_vm0, %v290_v19 }
  0x2d   : > { %2306 = vmatprep.mubr.msk.f32.mxu0 %vm330_vm0, %v291_v20 }
  0x30   : > { %2307 = vmatmul.mubr.msk.f32.gmra.mrb[8].mxu0 %vm330_vm0, %v292_v21 }
  0x31   : > { %2309 = vmatprep.mubr.msk.f32.mxu0 %vm330_vm0, %v293_v22 }
  0x34   : > { %2310 = vmatmul.mubr.msk.f32.gmra.mrb[10].mxu0 %vm330_vm0, %v294_v23 }
  0x35   : > { %2312 = vmatprep.mubr.msk.f32.mxu0 %vm330_vm0, %v295_v24 }
  0x38   : > { %2313 = vmatmul.mubr.msk.f32.gmra.mrb[12].mxu0 %vm330_vm0, %v296_v25 }
  0x39   : > { %2315 = vmatprep.mubr.msk.f32.mxu0 %vm330_vm0, %v297_v26 }
  0x3c   : > { %2316 = vmatmul.mubr.msk.f32.gmra.mrb[14].mxu0 %vm330_vm0, %v298_v27 }
  0x3d   : > { %2318 = vmatprep.mubr.msk.f32.mxu0 %vm330_vm0, %v299_v28 }
  0x40   : > { %2319 = vmatmul.mubr.msk.f32.gmra.mrb[16].mxu0 %vm330_vm0, %v300_v29 }
  0x41   : > { %2321 = vmatprep.mubr.msk.f32.mxu0 %vm330_vm0, %v301_v30 }
  0x44   : > { %2322 = vmatmul.mubr.msk.f32.gmra.mrb[18].mxu0 %vm330_vm0, %v302_v31 }
  0x45   : > { %2324 = vmatprep.mubr.msk.f32.mxu0 %vm330_vm0, %v303_v32 }
  0x48   : > { %2325 = vmatmul.mubr.msk.f32.gmra.mrb[20].mxu0 %vm330_vm0, %v304_v33 }
  0x49   : > { %2327 = vmatprep.mubr.msk.f32.mxu0 %vm330_vm0, %v305_v34 }
  0x4c   : > { %2328 = vmatmul.mubr.msk.f32.gmra.mrb[22].mxu0 %vm330_vm0, %v306_v35 }
  0x4d   : > { %2330 = vmatprep.mubr.msk.f32.mxu0 %vm330_vm0, %v307_v36 }
  0x50   : > { %2331 = vmatmul.mubr.msk.f32.gmra.mrb[24].mxu0 %vm330_vm0, %v308_v37 }
  0x51   : > { %2333 = vmatprep.mubr.msk.f32.mxu0 %vm330_vm0, %v309_v38 }
  0x54   : > { %2334 = vmatmul.mubr.msk.f32.gmra.mrb[26].mxu0 %vm330_vm0, %v310_v39 }
  0x55   : > { %2336 = vmatprep.mubr.msk.f32.mxu0 %vm330_vm0, %v311_v40 }
  0x58   : > { %2337 = vmatmul.mubr.msk.f32.gmra.mrb[28].mxu0 %vm330_vm0, %v312_v41 }
  0x59   : > { %2339 = vmatprep.mubr.msk.f32.mxu0 %vm330_vm0, %v313_v42 }
  0x5c   : > { %2340 = vmatmul.mubr.msk.f32.gmra.mrb[30].mxu0 %vm330_vm0, %v314_v43 }
  0xf3   : > { %v2296_v51 = vpop.f32.mrb[0].mxu0 }
  0xf4   : > { %v2806_v52 = vadd.f32 %v2296_v51, %v2803_v50  ;;  %v493_v53 = vpop.f32.mrb[1].mxu0 }
  0xf5   : > { %v2809_v54 = vadd.f32 %v2803_v50, %v493_v53 }
  0xf6   : > { %v654_v55 = vsel %vm652_vm1, %v2806_v52, 0.0  ;;  %v728_v56 = vmul.f32 %v2806_v52, %v2806_v52 }
  0xf7   : > { %v653_v57 = vsel %vm652_vm1, %v2809_v54, 0.0  ;;  %v727_v58 = vmul.f32 %v2809_v54, %v2809_v54  ;;  %v2299_v59 = vpop.f32.mrb[2].mxu0 }
  0xf8   : > { %v760_v60 = vsel %vm652_vm1, %v728_v56, 0.0  ;;  %v655_v61 = vadd.f32 %v654_v55, %v653_v57  ;;  %v2821_v62 = vadd.f32 %v2299_v59, %v2803_v50  ;;  %v503_v63 = vpop.f32.mrb[3].mxu0 }
  0xf9   : > { %v759_v0 = vsel %vm652_vm1, %v727_v58, 0.0  ;;  %v2825_v1 = vadd.f32 %v2803_v50, %v503_v63 }
  0xfa   : > { %v761_v2 = vadd.f32 %v760_v60, %v759_v0  ;;  %v730_v3 = vmul.f32 %v2821_v62, %v2821_v62  ;;  %v658_v10 = vsel %vm652_vm1, %v2821_v62, 0.0 }
  0xfb   : > { %v656_v4 = vsel %vm652_vm1, %v2825_v1, 0.0  ;;  %v729_v5 = vmul.f32 %v2825_v1, %v2825_v1  ;;  %v2302_v6 = vpop.f32.mrb[4].mxu0 }
  0xfc   : > { %v657_v7 = vadd.f32 %v656_v4, %v655_v61  ;;  %v2834_v8 = vadd.f32 %v2302_v6, %v2803_v50  ;;  %v513_v9 = vpop.f32.mrb[5].mxu0  ;;  %v764_v15 = vsel %vm652_vm1, %v730_v3, 0.0 }
  0xfd   : > { %v762_v11 = vsel %vm652_vm1, %v729_v5, 0.0  ;;  %v2840_v12 = vadd.f32 %v2803_v50, %v513_v9 }
  0xfe   : > { %v763_v13 = vadd.f32 %v762_v11, %v761_v2  ;;  %v659_v14 = vadd.f32 %v658_v10, %v657_v7  ;;  %v732_v16 = vmul.f32 %v2834_v8, %v2834_v8  ;;  %v662_v24 = vsel %vm652_vm1, %v2834_v8, 0.0 }
  0xff   : > { %v660_v17 = vsel %vm652_vm1, %v2840_v12, 0.0  ;;  %v731_v18 = vmul.f32 %v2840_v12, %v2840_v12  ;;  %v2305_v19 = vpop.f32.mrb[6].mxu0 }
 0x100   : > { %v661_v20 = vadd.f32 %v660_v17, %v659_v14  ;;  %v765_v21 = vadd.f32 %v764_v15, %v763_v13  ;;  %v2850_v22 = vadd.f32 %v2305_v19, %v2803_v50  ;;  %v523_v23 = vpop.f32.mrb[7].mxu0  ;;  %v768_v29 = vsel %vm652_vm1, %v732_v16, 0.0 }
 0x101   : > { %v766_v25 = vsel %vm652_vm1, %v731_v18, 0.0  ;;  %v2856_v26 = vadd.f32 %v2803_v50, %v523_v23 }
 0x102   : > { %v767_v27 = vadd.f32 %v766_v25, %v765_v21  ;;  %v663_v28 = vadd.f32 %v662_v24, %v661_v20  ;;  %v734_v30 = vmul.f32 %v2850_v22, %v2850_v22  ;;  %v666_v38 = vsel %vm652_vm1, %v2850_v22, 0.0 }
 0x103   : > { %v664_v31 = vsel %vm652_vm1, %v2856_v26, 0.0  ;;  %v733_v32 = vmul.f32 %v2856_v26, %v2856_v26  ;;  %v2308_v33 = vpop.f32.mrb[8].mxu0 }
 0x104   : > { %v665_v34 = vadd.f32 %v664_v31, %v663_v28  ;;  %v769_v35 = vadd.f32 %v768_v29, %v767_v27  ;;  %v2866_v36 = vadd.f32 %v2308_v33, %v2803_v50  ;;  %v533_v37 = vpop.f32.mrb[9].mxu0  ;;  %v772_v43 = vsel %vm652_vm1, %v734_v30, 0.0 }
 0x105   : > { %v770_v39 = vsel %vm652_vm1, %v733_v32, 0.0  ;;  %v2872_v40 = vadd.f32 %v2803_v50, %v533_v37 }
 0x106   : > { %v771_v41 = vadd.f32 %v770_v39, %v769_v35  ;;  %v667_v42 = vadd.f32 %v666_v38, %v665_v34  ;;  %v736_v44 = vmul.f32 %v2866_v36, %v2866_v36  ;;  %v670_v55 = vsel %vm652_vm1, %v2866_v36, 0.0 }
 0x107   : > { %v668_v45 = vsel %vm652_vm1, %v2872_v40, 0.0  ;;  %v735_v46 = vmul.f32 %v2872_v40, %v2872_v40  ;;  %v2311_v47 = vpop.f32.mrb[10].mxu0 }
 0x108   : > { %v669_v48 = vadd.f32 %v668_v45, %v667_v42  ;;  %v773_v49 = vadd.f32 %v772_v43, %v771_v41  ;;  %v2882_v51 = vadd.f32 %v2311_v47, %v2803_v50  ;;  %v543_v53 = vpop.f32.mrb[11].mxu0  ;;  %v776_v60 = vsel %vm652_vm1, %v736_v44, 0.0 }
 0x109   : > { %v774_v56 = vsel %vm652_vm1, %v735_v46, 0.0  ;;  %v2888_v57 = vadd.f32 %v2803_v50, %v543_v53 }
 0x10a   : > { %v775_v58 = vadd.f32 %v774_v56, %v773_v49  ;;  %v671_v59 = vadd.f32 %v670_v55, %v669_v48  ;;  %v738_v61 = vmul.f32 %v2882_v51, %v2882_v51  ;;  %v674_v7 = vsel %vm652_vm1, %v2882_v51, 0.0 }
 0x10b   : > { %v672_v63 = vsel %vm652_vm1, %v2888_v57, 0.0  ;;  %v737_v0 = vmul.f32 %v2888_v57, %v2888_v57  ;;  %v2314_v2 = vpop.f32.mrb[12].mxu0 }
 0x10c   : > { %v673_v3 = vadd.f32 %v672_v63, %v671_v59  ;;  %v777_v4 = vadd.f32 %v776_v60, %v775_v58  ;;  %v2898_v5 = vadd.f32 %v2314_v2, %v2803_v50  ;;  %v553_v6 = vpop.f32.mrb[13].mxu0  ;;  %v780_v14 = vsel %vm652_vm1, %v738_v61, 0.0 }
 0x10d   : > { %v778_v9 = vsel %vm652_vm1, %v737_v0, 0.0  ;;  %v2904_v10 = vadd.f32 %v2803_v50, %v553_v6 }
 0x10e   : > { %v779_v11 = vadd.f32 %v778_v9, %v777_v4  ;;  %v675_v13 = vadd.f32 %v674_v7, %v673_v3  ;;  %v740_v15 = vmul.f32 %v2898_v5, %v2898_v5  ;;  %v678_v24 = vsel %vm652_vm1, %v2898_v5, 0.0 }
 0x10f   : > { %v676_v16 = vsel %vm652_vm1, %v2904_v10, 0.0  ;;  %v739_v17 = vmul.f32 %v2904_v10, %v2904_v10  ;;  %v2317_v18 = vpop.f32.mrb[14].mxu0 }
 0x110   : > { %v677_v19 = vadd.f32 %v676_v16, %v675_v13  ;;  %v781_v20 = vadd.f32 %v780_v14, %v779_v11  ;;  %v2914_v21 = vadd.f32 %v2317_v18, %v2803_v50  ;;  %v563_v23 = vpop.f32.mrb[15].mxu0  ;;  %v784_v30 = vsel %vm652_vm1, %v740_v15, 0.0 }
 0x111   : > { %v782_v25 = vsel %vm652_vm1, %v739_v17, 0.0  ;;  %v2920_v27 = vadd.f32 %v2803_v50, %v563_v23 }
 0x112   : > { %v783_v28 = vadd.f32 %v782_v25, %v781_v20  ;;  %v679_v29 = vadd.f32 %v678_v24, %v677_v19  ;;  %v742_v31 = vmul.f32 %v2914_v21, %v2914_v21  ;;  %v682_v41 = vsel %vm652_vm1, %v2914_v21, 0.0 }
 0x113   : > { %v680_v32 = vsel %vm652_vm1, %v2920_v27, 0.0  ;;  %v741_v33 = vmul.f32 %v2920_v27, %v2920_v27  ;;  %v2320_v34 = vpop.f32.mrb[16].mxu0 }
 0x114   : > { %v681_v35 = vadd.f32 %v680_v32, %v679_v29  ;;  %v785_v37 = vadd.f32 %v784_v30, %v783_v28  ;;  %v2930_v38 = vadd.f32 %v2320_v34, %v2803_v50  ;;  %v573_v39 = vpop.f32.mrb[17].mxu0  ;;  %v788_v48 = vsel %vm652_vm1, %v742_v31, 0.0 }
 0x115   : > { %v786_v42 = vsel %vm652_vm1, %v741_v33, 0.0  ;;  %v2936_v43 = vadd.f32 %v2803_v50, %v573_v39 }
 0x116   : > { %v683_v44 = vadd.f32 %v682_v41, %v681_v35  ;;  %v787_v45 = vadd.f32 %v786_v42, %v785_v37  ;;  %v691_v46 = vsel %vm652_vm1, %v2930_v38, 0.0  ;;  %v744_v47 = vmul.f32 %v2930_v38, %v2930_v38 }
 0x117   : > { %v690_v49 = vsel %vm652_vm1, %v2936_v43, 0.0  ;;  %v743_v53 = vmul.f32 %v2936_v43, %v2936_v43  ;;  %v2323_v55 = vpop.f32.mrb[18].mxu0 }
 0x118   : > { %v684_v56 = vrot.slane %v683_v44, 4  ;;  %v789_v58 = vadd.f32 %v788_v48, %v787_v45  ;;  %v797_v59 = vsel %vm652_vm1, %v744_v47, 0.0  ;;  %v692_v60 = vadd.f32 %v691_v46, %v690_v49  ;;  %v583_v61 = vpop.f32.mrb[19].mxu0 }
 0x119   : > { %v796_v63 = vsel %vm652_vm1, %v743_v53, 0.0  ;;  %v2950_v0 = vadd.f32 %v2323_v55, %v2803_v50  ;;  %v2953_v2 = vadd.f32 %v2803_v50, %v583_v61 }
 0x11a   : > { %v685_v3 = vadd.f32 %v684_v56, %v683_v44  ;;  %v790_v4 = vrot.slane %v789_v58, 4  ;;  %v798_v6 = vadd.f32 %v797_v59, %v796_v63 }
 0x11b   : > { %v746_v7 = vmul.f32 %v2950_v0, %v2950_v0  ;;  %v693_v9 = vsel %vm652_vm1, %v2953_v2, 0.0  ;;  %v745_v11 = vmul.f32 %v2953_v2, %v2953_v2  ;;  %v2326_v13 = vpop.f32.mrb[20].mxu0  ;;  %v695_v19 = vsel %vm652_vm1, %v2950_v0, 0.0 }
 0x11c   : > { %v686_v14 = vrot.slane %v685_v3, 2  ;;  %v791_v15 = vadd.f32 %v790_v4, %v789_v58  ;;  %v694_v16 = vadd.f32 %v693_v9, %v692_v60  ;;  %v2962_v17 = vadd.f32 %v2326_v13, %v2803_v50  ;;  %v593_v18 = vpop.f32.mrb[21].mxu0 }
 0x11d   : > { %v799_v20 = vsel %vm652_vm1, %v745_v11, 0.0  ;;  %v2968_v23 = vadd.f32 %v2803_v50, %v593_v18  ;;  %v801_v28 = vsel %vm652_vm1, %v746_v7, 0.0 }
 0x11e   : > { %v687_v24 = vadd.f32 %v686_v14, %v685_v3  ;;  %v792_v25 = vrot.slane %v791_v15, 2  ;;  %v800_v29 = vadd.f32 %v799_v20, %v798_v6  ;;  %v748_v30 = vmul.f32 %v2962_v17, %v2962_v17 }
 0x11f   : > { %v696_v31 = vadd.f32 %v695_v19, %v694_v16  ;;  %v697_v32 = vsel %vm652_vm1, %v2968_v23, 0.0  ;;  %v747_v33 = vmul.f32 %v2968_v23, %v2968_v23  ;;  %v2329_v34 = vpop.f32.mrb[22].mxu0  ;;  %v699_v44 = vsel %vm652_vm1, %v2962_v17, 0.0 }
 0x120   : > { %v688_v35 = vrot.slane %v687_v24, 1  ;;  %v793_v37 = vadd.f32 %v792_v25, %v791_v15  ;;  %v802_v39 = vadd.f32 %v801_v28, %v800_v29  ;;  %v2978_v41 = vadd.f32 %v2329_v34, %v2803_v50  ;;  %v603_v42 = vpop.f32.mrb[23].mxu0 }
 0x121   : > { %v698_v45 = vadd.f32 %v697_v32, %v696_v31  ;;  %v803_v46 = vsel %vm652_vm1, %v747_v33, 0.0  ;;  %v2984_v47 = vadd.f32 %v2803_v50, %v603_v42  ;;  %v805_v53 = vsel %vm652_vm1, %v748_v30, 0.0 }
 0x122   : > { %v689_v48 = vadd.f32 %v688_v35, %v687_v24  ;;  %v794_v49 = vrot.slane %v793_v37, 1  ;;  %v804_v55 = vadd.f32 %v803_v46, %v802_v39  ;;  %v750_v56 = vmul.f32 %v2978_v41, %v2978_v41 }
 0x123   : > { %v700_v58 = vadd.f32 %v699_v44, %v698_v45  ;;  %v701_v59 = vsel %vm652_vm1, %v2984_v47, 0.0  ;;  %v749_v60 = vmul.f32 %v2984_v47, %v2984_v47  ;;  %v2332_v61 = vpop.f32.mrb[24].mxu0  ;;  %v703_v16 = vsel %vm652_vm1, %v2978_v41, 0.0 }
 0x124   : > { %v795_v63 = vadd.f32 %v794_v49, %v793_v37  ;;  %v2993_v3 = vmul.f32 0.0078125, %v689_v48  ;;  %v806_v4 = vadd.f32 %v805_v53, %v804_v55  ;;  %v2996_v6 = vadd.f32 %v2332_v61, %v2803_v50  ;;  %v613_v7 = vpop.f32.mrb[25].mxu0 }
 0x125   : > { %v702_v9 = vadd.f32 %v701_v59, %v700_v58  ;;  %v807_v11 = vsel %vm652_vm1, %v749_v60, 0.0  ;;  %v3000_v13 = vadd.f32 %v2803_v50, %v613_v7  ;;  %v809_v19 = vsel %vm652_vm1, %v750_v56, 0.0 }
 0x126   : > { %v835_v14 = vmul.f32 0.0078125, %v795_v63  ;;  %v837_v15 = vmul.f32 %v2993_v3, %v2993_v3  ;;  %v808_v18 = vadd.f32 %v807_v11, %v806_v4  ;;  %v752_v20 = vmul.f32 %v2996_v6, %v2996_v6 }
 0x127   : > { %v704_v24 = vadd.f32 %v703_v16, %v702_v9  ;;  %v705_v25 = vsel %vm652_vm1, %v3000_v13, 0.0  ;;  %v2335_v28 = vpop.f32.mrb[26].mxu0  ;;  %v751_v30 = vmul.f32 %v3000_v13, %v3000_v13  ;;  %v707_v39 = vsel %vm652_vm1, %v2996_v6, 0.0 }
 0x128   : > { %v839_v29 = vsub.f32 %v835_v14, %v837_v15  ;;  %v810_v31 = vadd.f32 %v809_v19, %v808_v18  ;;  %v3014_v32 = vadd.f32 %v2335_v28, %v2803_v50  ;;  %v623_v33 = vpop.f32.mrb[27].mxu0  ;;  %v813_v53 = vsel %vm652_vm1, %v752_v20, 0.0 }
 0x129   : > { %v706_v34 = vadd.f32 %v705_v25, %v704_v24  ;;  %v3017_v35 = vadd.f32 %v2803_v50, %v623_v33  ;;  %v811_v42 = vsel %vm652_vm1, %v751_v30, 0.0 }
 0x12a   : > { %v841_v37 = vadd.f32 1e-05, %v839_v29  ;;  %v812_v44 = vadd.f32 %v811_v42, %v810_v31  ;;  %v754_v55 = vmul.f32 %v3014_v32, %v3014_v32  ;;  %v711_v4 = vsel %vm652_vm1, %v3014_v32, 0.0 }
 0x12b   : > { %v708_v45 = vadd.f32 %v707_v39, %v706_v34  ;;  %v709_v46 = vsel %vm652_vm1, %v3017_v35, 0.0  ;;  %v753_v48 = vmul.f32 %v3017_v35, %v3017_v35  ;;  %v2338_v49 = vpop.f32.mrb[28].mxu0 }
 0x12c   : > { %2531 = vrsqrt.f32 %v841_v37  ;;  %v3030_v56 = vadd.f32 %v2338_v49, %v2803_v50  ;;  %v633_v58 = vpop.f32.mrb[29].mxu0  ;;  %v814_v60 = vadd.f32 %v813_v53, %v812_v44  ;;  %v817_v16 = vsel %vm652_vm1, %v754_v55, 0.0 }
 0x12d   : > { %v710_v59 = vadd.f32 %v709_v46, %v708_v45  ;;  %v815_v61 = vsel %vm652_vm1, %v753_v48, 0.0  ;;  %v3034_v63 = vadd.f32 %v2803_v50, %v633_v58  ;;  %v845_v44 = vsub.f32 0.0, %v2993_v3 }
 0x12e   : > { %v816_v7 = vadd.f32 %v815_v61, %v814_v60  ;;  %v756_v18 = vmul.f32 %v3030_v56, %v3030_v56  ;;  %v715_v30 = vsel %vm652_vm1, %v3030_v56, 0.0 }
 0x12f   : > { %v712_v9 = vadd.f32 %v711_v4, %v710_v59  ;;  %v713_v11 = vsel %vm652_vm1, %v3034_v63, 0.0  ;;  %v755_v14 = vmul.f32 %v3034_v63, %v3034_v63  ;;  %v2341_v15 = vpop.f32.mrb[30].mxu0 }
 0x130   : > { %v3046_v19 = vadd.f32 %v2341_v15, %v2803_v50  ;;  %v643_v20 = vpop.f32.mrb[31].mxu0  ;;  %v818_v25 = vadd.f32 %v817_v16, %v816_v7  ;;  %v821_v42 = vsel %vm652_vm1, %v756_v18, 0.0 }
 0x131   : > { %v714_v24 = vadd.f32 %v713_v11, %v712_v9  ;;  %v819_v28 = vsel %vm652_vm1, %v755_v14, 0.0  ;;  %v3050_v29 = vadd.f32 %v2803_v50, %v643_v20 }
 0x132   : > { %v758_v31 = vmul.f32 %v3046_v19, %v3046_v19  ;;  %v820_v33 = vadd.f32 %v819_v28, %v818_v25  ;;  %v719_v49 = vsel %vm652_vm1, %v3046_v19, 0.0 }
 0x133   : > { %v716_v34 = vadd.f32 %v715_v30, %v714_v24  ;;  %v717_v37 = vsel %vm652_vm1, %v3050_v29, 0.0  ;;  %v757_v39 = vmul.f32 %v3050_v29, %v3050_v29 }
 0x134   : > { %v822_v45 = vadd.f32 %v821_v42, %v820_v33  ;;  %v825_v53 = vsel %vm652_vm1, %v758_v31, 0.0 }
 0x135   : > { %v718_v50 = vadd.f32 %v717_v37, %v716_v34  ;;  %v823_v46 = vsel %vm652_vm1, %v757_v39, 0.0 }
 0x136   : > { %v2532_v48 = vpop.eup %2531  ;;  %v824_v59 = vadd.f32 %v823_v46, %v822_v45 }
 0x137   : > { %v3066_v55 = vmul.f32 %v2532_v48, %v845_v44  ;;  %v720_v58 = vadd.f32 %v719_v49, %v718_v50  ;;  %v849_v60 = vmul.f32 %v2532_v48, %v2809_v54  ;;  %v863_v61 = vmul.f32 %v2532_v48, %v2920_v27 }
 0x138   : > { %v850_v3 = vmul.f32 %v2532_v48, %v2806_v52  ;;  %v864_v4 = vmul.f32 %v2532_v48, %v2914_v21  ;;  %v851_v7 = vmul.f32 %v2532_v48, %v2825_v1  ;;  %v826_v11 = vadd.f32 %v825_v53, %v824_v59 }
 0x139   : > { %v721_v9 = vrot.slane %v720_v58, 4  ;;  %v881_v14 = vadd.f32 %v849_v60, %v3066_v55  ;;  %v852_v15 = vmul.f32 %v2532_v48, %v2821_v62  ;;  %v895_v16 = vadd.f32 %v863_v61, %v3066_v55 }
 0x13a   : > { %v882_v18 = vadd.f32 %v850_v3, %v3066_v55  ;;  %v896_v54 = vadd.f32 %v864_v4, %v3066_v55  ;;  %v883_v27 = vadd.f32 %v851_v7, %v3066_v55  ;;  %v827_v52 = vrot.slane %v826_v11, 4 }
 0x13b   : > { %v722_v20 = vadd.f32 %v721_v9, %v720_v58  ;;  %v913_v24 = vmax.f32 %v881_v14, 0.0  ;;  %v884_v21 = vadd.f32 %v852_v15, %v3066_v55  ;;  %v927_v1 = vmax.f32 %v895_v16, 0.0 }
 0x13c   : > { %v914_v25 = vmax.f32 %v882_v18, 0.0  ;;  %v928_v28 = vmax.f32 %v896_v54, 0.0  ;;  %v828_v31 = vadd.f32 %v827_v52, %v826_v11  ;;  %v915_v62 = vmax.f32 %v883_v27, 0.0 }
 0x13d   : > { %v723_v30 = vrot.slane %v722_v20, 2  ;;  %2350 = vmatprep.mubr.msk.f32.mxu0 %vm652_vm1, %v913_v24  ;;  %v853_v33 = vmul.f32 %v2532_v48, %v2840_v12  ;;  %2371 = vmatprep.mubr.msk.f32.mxu1 %vm652_vm1, %v927_v1  ;;  %v916_v34 = vmax.f32 %v884_v21, 0.0  ;;  %v854_v37 = vmul.f32 %v2532_v48, %v2834_v8 }
 0x13e   : > { %2351 = vmatmul.mubr.msk.f32.vlgmr.msra.gmra.mrb[32].mxu0 %vm652_vm1, %v914_v25  ;;  %v855_v39 = vmul.f32 %v2532_v48, %v2856_v26  ;;  %v856_v42 = vmul.f32 %v2532_v48, %v2850_v22  ;;  %v829_v50 = vrot.slane %v828_v31, 2  ;;  %2372 = vmatmul.mubr.msk.f32.vlgmr.msra.gmra.mrb[0].mxu1 %vm652_vm1, %v928_v28  ;;  %v857_v12 = vmul.f32 %v2532_v48, %v2872_v40 }
 0x13f   : > { %v724_v44 = vadd.f32 %v723_v30, %v722_v20  ;;  %2353 = vmatprep.mubr.msk.f32.mxu0 %vm652_vm1, %v915_v62  ;;  %v885_v45 = vadd.f32 %v853_v33, %v3066_v55  ;;  %v886_v46 = vadd.f32 %v854_v37, %v3066_v55  ;;  %v858_v26 = vmul.f32 %v2532_v48, %v2866_v36 }
 0x140   : > { %v887_v49 = vadd.f32 %v855_v39, %v3066_v55  ;;  %v888_v8 = vadd.f32 %v856_v42, %v3066_v55  ;;  %v830_v22 = vadd.f32 %v829_v50, %v828_v31  ;;  %v889_v59 = vadd.f32 %v857_v12, %v3066_v55 }
 0x141   : > { %v725_v53 = vrot.slane %v724_v44, 1  ;;  %v917_v58 = vmax.f32 %v885_v45, 0.0  ;;  %v890_v60 = vadd.f32 %v858_v26, %v3066_v55  ;;  %v859_v40 = vmul.f32 %v2532_v48, %v2888_v57 }
 0x142   : > { %2354 = vmatmul.mubr.msk.f32.gmra.mrb[34].mxu0 %vm652_vm1, %v916_v34  ;;  %v831_v3 = vrot.slane %v830_v22, 1  ;;  %v918_v4 = vmax.f32 %v886_v46, 0.0  ;;  %v860_v7 = vmul.f32 %v2532_v48, %v2882_v51  ;;  %v861_v36 = vmul.f32 %v2532_v48, %v2904_v10 }
 0x143   : > { %v726_v61 = vadd.f32 %v725_v53, %v724_v44  ;;  %2356 = vmatprep.mubr.msk.f32.mxu0 %vm652_vm1, %v917_v58  ;;  %v862_v9 = vmul.f32 %v2532_v48, %v2898_v5  ;;  %v919_v15 = vmax.f32 %v887_v49, 0.0  ;;  %v891_v16 = vadd.f32 %v859_v40, %v3066_v55 }
 0x144   : > { %v832_v11 = vadd.f32 %v831_v3, %v830_v22  ;;  %v892_v18 = vadd.f32 %v860_v7, %v3066_v55  ;;  %v893_v54 = vadd.f32 %v861_v36, %v3066_v55  ;;  %v920_v51 = vmax.f32 %v888_v8, 0.0 }
 0x145   : > { %v834_v14 = vmul.f32 0.0078125, %v726_v61  ;;  %v894_v57 = vadd.f32 %v862_v9, %v3066_v55  ;;  %v921_v5 = vmax.f32 %v889_v59, 0.0  ;;  %v922_v52 = vmax.f32 %v890_v60, 0.0 }
 0x146   : > { %2357 = vmatmul.mubr.msk.f32.gmra.mrb[36].mxu0 %vm652_vm1, %v918_v4  ;;  %v836_v27 = vmul.f32 0.0078125, %v832_v11  ;;  %v923_v24 = vmax.f32 %v891_v16, 0.0  ;;  %v924_v55 = vmax.f32 %v892_v18, 0.0  ;;  %v925_v21 = vmax.f32 %v893_v54, 0.0  ;;  %v1569_v54 = vld [vmem:[%s3591_s5] sm:$0xff] }
 0x147   : > { %v838_v20 = vmul.f32 %v834_v14, %v834_v14  ;;  %2359 = vmatprep.mubr.msk.f32.mxu0 %vm652_vm1, %v919_v15  ;;  %v926_v1 = vmax.f32 %v894_v57, 0.0  ;;  %v846_v25 = vsub.f32 0.0, %v834_v14  ;;  %v1570_v57 = vld [vmem:[%s3591_s5 + $0x8] sm:$0xff] }
 0x149   : > { %v840_v10 = vsub.f32 %v836_v27, %v838_v20  ;;  %v1571_v27 = vld [vmem:[%s3591_s5 + $0x10] sm:$0xff]  ;;  %v2478_v20 = vpack.c.bf16 %v1570_v57, %v1569_v54 }
 0x14a   : > { %2360 = vmatmul.mubr.msk.f32.gmra.mrb[38].mxu0 %vm652_vm1, %v920_v51  ;;  %v1572_v51 = vld [vmem:[%s3591_s5 + $0x18] sm:$0xff] }
 0x14b   : > { %v842_v48 = vadd.f32 1e-05, %v840_v10  ;;  %2362 = vmatprep.mubr.msk.f32.mxu0 %vm652_vm1, %v921_v5  ;;  %v2482_v10 = vpack.c.bf16 %v1572_v51, %v1571_v27  ;;  %2479 = vmatprep.subr.bf16.mxu1 %v2478_v20  ;;  %v3163_v5 = vld [vmem:[%s3590_s4] ss:$0 sm:$0xff] }
 0x14c   : > { %2481 = vmatpush3.bf16.msra.mxu1 %v2478_v20 }
 0x14d   : > { %2533 = vrsqrt.f32 %v842_v48  ;;  %2483 = vmatprep.subr.bf16.mxu1 %v2482_v10 }
 0x14e   : > { %2363 = vmatmul.mubr.msk.f32.gmra.mrb[40].mxu0 %vm652_vm1, %v922_v52 }
 0x14f   : > { %2365 = vmatprep.mubr.msk.f32.mxu0 %vm652_vm1, %v923_v24 }
 0x150   : > { %2485 = vmatpush3.bf16.msra.mxu1 %v2482_v10 }
 0x152   : > { %2366 = vmatmul.mubr.msk.f32.gmra.mrb[42].mxu0 %vm652_vm1, %v924_v55 }
 0x153   : > { %2368 = vmatprep.mubr.msk.f32.mxu0 %vm652_vm1, %v925_v21 }
 0x156   : > { %2369 = vmatmul.mubr.msk.f32.gmra.mrb[44].mxu0 %vm652_vm1, %v926_v1 }
 0x157   : > { %v2534_v28 = vpop.eup %2533 }
 0x158   : > { %v848_v30 = vmul.f32 %v2534_v28, %v846_v25  ;;  %v879_v31 = vmul.f32 %v2534_v28, %v3050_v29  ;;  %v865_v62 = vmul.f32 %v2534_v28, %v2936_v43  ;;  %v866_v33 = vmul.f32 %v2534_v28, %v2930_v38 }
 0x159   : > { %v867_v34 = vmul.f32 %v2534_v28, %v2953_v2  ;;  %v868_v37 = vmul.f32 %v2534_v28, %v2950_v0  ;;  %v869_v39 = vmul.f32 %v2534_v28, %v2968_v23  ;;  %v870_v42 = vmul.f32 %v2534_v28, %v2962_v17 }
 0x15a   : > { %v911_v44 = vadd.f32 %v879_v31, %v848_v30  ;;  %v897_v50 = vadd.f32 %v865_v62, %v848_v30  ;;  %v898_v45 = vadd.f32 %v866_v33, %v848_v30  ;;  %v871_v12 = vmul.f32 %v2534_v28, %v2984_v47 }
 0x15b   : > { %v899_v46 = vadd.f32 %v867_v34, %v848_v30  ;;  %v900_v49 = vadd.f32 %v868_v37, %v848_v30  ;;  %v901_v29 = vadd.f32 %v869_v39, %v848_v30  ;;  %v902_v8 = vadd.f32 %v870_v42, %v848_v30 }
 0x15c   : > { %v929_v43 = vmax.f32 %v897_v50, 0.0  ;;  %v930_v26 = vmax.f32 %v898_v45, 0.0  ;;  %v903_v38 = vadd.f32 %v871_v12, %v848_v30  ;;  %v872_v2 = vmul.f32 %v2534_v28, %v2978_v41 }
 0x15d   : > { %v931_v0 = vmax.f32 %v899_v46, 0.0  ;;  %v873_v17 = vmul.f32 %v2534_v28, %v3000_v13  ;;  %v874_v53 = vmul.f32 %v2534_v28, %v2996_v6  ;;  %v875_v47 = vmul.f32 %v2534_v28, %v3017_v35 }
 0x15e   : > { %2374 = vmatprep.mubr.msk.f32.mxu1 %vm652_vm1, %v929_v43  ;;  %v904_v23 = vadd.f32 %v872_v2, %v848_v30  ;;  %v876_v22 = vmul.f32 %v2534_v28, %v3014_v32  ;;  %v877_v58 = vmul.f32 %v2534_v28, %v3034_v63  ;;  %v878_v59 = vmul.f32 %v2534_v28, %v3030_v56 }
 0x15f   : > { %2375 = vmatmul.mubr.msk.f32.gmra.mrb[2].mxu1 %vm652_vm1, %v930_v26  ;;  %v932_v41 = vmax.f32 %v900_v49, 0.0  ;;  %v905_v60 = vadd.f32 %v873_v17, %v848_v30  ;;  %v906_v61 = vadd.f32 %v874_v53, %v848_v30  ;;  %v907_v3 = vadd.f32 %v875_v47, %v848_v30 }
 0x160   : > { %2377 = vmatprep.mubr.msk.f32.mxu1 %vm652_vm1, %v931_v0  ;;  %v908_v40 = vadd.f32 %v876_v22, %v848_v30  ;;  %v909_v13 = vadd.f32 %v877_v58, %v848_v30  ;;  %v910_v4 = vadd.f32 %v878_v59, %v848_v30  ;;  %v933_v6 = vmax.f32 %v901_v29, 0.0 }
 0x161   : > { %v880_v7 = vmul.f32 %v2534_v28, %v3046_v19  ;;  %v934_v35 = vmax.f32 %v902_v8, 0.0  ;;  %v935_v63 = vmax.f32 %v903_v38, 0.0  ;;  %v936_v56 = vmax.f32 %v904_v23, 0.0 }
 0x162   : > { %v937_v36 = vmax.f32 %v905_v60, 0.0  ;;  %v938_v9 = vmax.f32 %v906_v61, 0.0  ;;  %v939_v11 = vmax.f32 %v907_v3, 0.0  ;;  %v940_v19 = vmax.f32 %v908_v40, 0.0 }
 0x163   : > { %2378 = vmatmul.mubr.msk.f32.gmra.mrb[4].mxu1 %vm652_vm1, %v932_v41  ;;  %v912_v32 = vadd.f32 %v880_v7, %v848_v30  ;;  %v941_v14 = vmax.f32 %v909_v13, 0.0  ;;  %v942_v15 = vmax.f32 %v910_v4, 0.0  ;;  %v943_v16 = vmax.f32 %v911_v44, 0.0 }
 0x164   : > { %2380 = vmatprep.mubr.msk.f32.mxu1 %vm652_vm1, %v933_v6 }
 0x165   : > { %v944_v18 = vmax.f32 %v912_v32, 0.0 }
 0x167   : > { %2381 = vmatmul.mubr.msk.f32.gmra.mrb[6].mxu1 %vm652_vm1, %v934_v35 }
 0x168   : > { %2383 = vmatprep.mubr.msk.f32.mxu1 %vm652_vm1, %v935_v63 }
 0x16b   : > { %2384 = vmatmul.mubr.msk.f32.gmra.mrb[8].mxu1 %vm652_vm1, %v936_v56 }
 0x16c   : > { %2386 = vmatprep.mubr.msk.f32.mxu1 %vm652_vm1, %v937_v36 }
 0x16f   : > { %2387 = vmatmul.mubr.msk.f32.gmra.mrb[10].mxu1 %vm652_vm1, %v938_v9 }
 0x170   : > { %2389 = vmatprep.mubr.msk.f32.mxu1 %vm652_vm1, %v939_v11 }
 0x173   : > { %2390 = vmatmul.mubr.msk.f32.gmra.mrb[12].mxu1 %vm652_vm1, %v940_v19 }
 0x174   : > { %2392 = vmatprep.mubr.msk.f32.mxu1 %vm652_vm1, %v941_v14 }
 0x177   : > { %2393 = vmatmul.mubr.msk.f32.gmra.mrb[14].mxu1 %vm652_vm1, %v942_v15 }
 0x178   : > { %2395 = vmatprep.mubr.msk.f32.mxu1 %vm652_vm1, %v943_v16 }
 0x17b   : > { %2396 = vmatmul.mubr.msk.f32.gmra.mrb[16].mxu1 %vm652_vm1, %v944_v18 }
 0x211   : > { %v2352_v48 = vpop.f32.mrb[32].mxu0  ;;  %v3168_v24 = vpop.f32.mrb[0].mxu1 }
 0x212   : > { %v3166_v52 = vadd.f32 %v2352_v48, %v3163_v5  ;;  %v1118_v55 = vpop.f32.mrb[33].mxu0  ;;  %v3173_v1 = vpop.f32.mrb[1].mxu1 }
 0x213   : > { %v3171_v21 = vadd.f32 %v3163_v5, %v1118_v55 }
 0x214   : > { %v1278_v25 = vsel %vm652_vm1, %v3166_v52, 0.0  ;;  %v1352_v28 = vmul.f32 %v3166_v52, %v3166_v52 }
 0x215   : > { %v1277_v30 = vsel %vm652_vm1, %v3171_v21, 0.0  ;;  %v1351_v31 = vmul.f32 %v3171_v21, %v3171_v21  ;;  %v2355_v62 = vpop.f32.mrb[34].mxu0 }
 0x216   : > { %v1384_v33 = vsel %vm652_vm1, %v1352_v28, 0.0  ;;  %v1279_v34 = vadd.f32 %v1278_v25, %v1277_v30  ;;  %v1128_v37 = vpop.f32.mrb[35].mxu0  ;;  %v3186_v42 = vadd.f32 %v2355_v62, %v3163_v5 }
 0x217   : > { %v1383_v39 = vsel %vm652_vm1, %v1351_v31, 0.0  ;;  %v3189_v44 = vadd.f32 %v3163_v5, %v1128_v37 }
 0x218   : > { %v1385_v50 = vadd.f32 %v1384_v33, %v1383_v39  ;;  %v1354_v45 = vmul.f32 %v3186_v42, %v3186_v42  ;;  %v1282_v26 = vsel %vm652_vm1, %v3186_v42, 0.0 }
 0x219   : > { %v1280_v12 = vsel %vm652_vm1, %v3189_v44, 0.0  ;;  %v1353_v46 = vmul.f32 %v3189_v44, %v3189_v44  ;;  %v2358_v49 = vpop.f32.mrb[36].mxu0 }
 0x21a   : > { %v1281_v29 = vadd.f32 %v1280_v12, %v1279_v34  ;;  %v3198_v8 = vadd.f32 %v2358_v49, %v3163_v5  ;;  %v1138_v43 = vpop.f32.mrb[37].mxu0  ;;  %v1388_v17 = vsel %vm652_vm1, %v1354_v45, 0.0 }
 0x21b   : > { %v1386_v38 = vsel %vm652_vm1, %v1353_v46, 0.0  ;;  %v3204_v2 = vadd.f32 %v3163_v5, %v1138_v43 }
 0x21c   : > { %v1387_v0 = vadd.f32 %v1386_v38, %v1385_v50  ;;  %v1283_v23 = vadd.f32 %v1282_v26, %v1281_v29  ;;  %v1356_v53 = vmul.f32 %v3198_v8, %v3198_v8  ;;  %v1286_v3 = vsel %vm652_vm1, %v3198_v8, 0.0 }
 0x21d   : > { %v1284_v47 = vsel %vm652_vm1, %v3204_v2, 0.0  ;;  %v1355_v22 = vmul.f32 %v3204_v2, %v3204_v2  ;;  %v2361_v58 = vpop.f32.mrb[38].mxu0  ;;  %v3266_v26 = vadd.f32 %v3163_v5, %v3173_v1 }
 0x21e   : > { %v1285_v59 = vadd.f32 %v1284_v47, %v1283_v23  ;;  %v1389_v41 = vadd.f32 %v1388_v17, %v1387_v0  ;;  %v3214_v60 = vadd.f32 %v2361_v58, %v3163_v5  ;;  %v1148_v61 = vpop.f32.mrb[39].mxu0  ;;  %v1392_v7 = vsel %vm652_vm1, %v1356_v53, 0.0 }
 0x21f   : > { %v1390_v40 = vsel %vm652_vm1, %v1355_v22, 0.0  ;;  %v3220_v13 = vadd.f32 %v3163_v5, %v1148_v61  ;;  %v3276_v17 = vadd.f32 %v3168_v24, %v3163_v5 }
 0x220   : > { %v1391_v4 = vadd.f32 %v1390_v40, %v1389_v41  ;;  %v1287_v6 = vadd.f32 %v1286_v3, %v1285_v59  ;;  %v1358_v32 = vmul.f32 %v3214_v60, %v3214_v60  ;;  %v1290_v14 = vsel %vm652_vm1, %v3214_v60, 0.0 }
 0x221   : > { %v1288_v35 = vsel %vm652_vm1, %v3220_v13, 0.0  ;;  %v1357_v63 = vmul.f32 %v3220_v13, %v3220_v13  ;;  %v2364_v56 = vpop.f32.mrb[40].mxu0  ;;  %v1365_v3 = vmul.f32 %v3266_v26, %v3266_v26 }
 0x222   : > { %v1289_v36 = vadd.f32 %v1288_v35, %v1287_v6  ;;  %v1393_v9 = vadd.f32 %v1392_v7, %v1391_v4  ;;  %v3230_v11 = vadd.f32 %v2364_v56, %v3163_v5  ;;  %v1158_v19 = vpop.f32.mrb[41].mxu0  ;;  %v1396_v57 = vsel %vm652_vm1, %v1358_v32, 0.0 }
 0x223   : > { %v1394_v15 = vsel %vm652_vm1, %v1357_v63, 0.0  ;;  %v3236_v16 = vadd.f32 %v3163_v5, %v1158_v19  ;;  %v1366_v7 = vmul.f32 %v3276_v17, %v3276_v17  ;;  %v1304_v32 = vsel %vm652_vm1, %v3266_v26, 0.0 }
 0x224   : > { %v1395_v18 = vadd.f32 %v1394_v15, %v1393_v9  ;;  %v1291_v54 = vadd.f32 %v1290_v14, %v1289_v36  ;;  %v1360_v27 = vmul.f32 %v3230_v11, %v3230_v11  ;;  %v1294_v30 = vsel %vm652_vm1, %v3230_v11, 0.0 }
 0x225   : > { %v1292_v20 = vsel %vm652_vm1, %v3236_v16, 0.0  ;;  %v1359_v51 = vmul.f32 %v3236_v16, %v3236_v16  ;;  %v2367_v10 = vpop.f32.mrb[42].mxu0  ;;  %v1306_v9 = vsel %vm652_vm1, %v3276_v17, 0.0  ;;  %v1410_v19 = vsel %vm652_vm1, %v1365_v3, 0.0 }
 0x226   : > { %v1293_v48 = vadd.f32 %v1292_v20, %v1291_v54  ;;  %v1397_v55 = vadd.f32 %v1396_v57, %v1395_v18  ;;  %v3246_v25 = vadd.f32 %v2367_v10, %v3163_v5  ;;  %v1168_v28 = vpop.f32.mrb[43].mxu0  ;;  %v1400_v37 = vsel %vm652_vm1, %v1360_v27, 0.0 }
 0x227   : > { %v1398_v31 = vsel %vm652_vm1, %v1359_v51, 0.0  ;;  %v3252_v62 = vadd.f32 %v3163_v5, %v1168_v28  ;;  %v1412_v27 = vsel %vm652_vm1, %v1366_v7, 0.0 }
 0x228   : > { %v1399_v33 = vadd.f32 %v1398_v31, %v1397_v55  ;;  %v1295_v34 = vadd.f32 %v1294_v30, %v1293_v48  ;;  %v1362_v39 = vmul.f32 %v3246_v25, %v3246_v25  ;;  %v1298_v38 = vsel %vm652_vm1, %v3246_v25, 0.0 }
 0x229   : > { %v1296_v50 = vsel %vm652_vm1, %v3252_v62, 0.0  ;;  %v1361_v45 = vmul.f32 %v3252_v62, %v3252_v62  ;;  %v2370_v12 = vpop.f32.mrb[44].mxu0 }
 0x22a   : > { %v1297_v46 = vadd.f32 %v1296_v50, %v1295_v34  ;;  %v1401_v49 = vadd.f32 %v1400_v37, %v1399_v33  ;;  %v3262_v29 = vadd.f32 %v2370_v12, %v3163_v5  ;;  %v1178_v43 = vpop.f32.mrb[45].mxu0  ;;  %v1404_v22 = vsel %vm652_vm1, %v1362_v39, 0.0 }
 0x22b   : > { %v1402_v0 = vsel %vm652_vm1, %v1361_v45, 0.0  ;;  %v3272_v23 = vadd.f32 %v3163_v5, %v1178_v43 }
 0x22c   : > { %v1403_v53 = vadd.f32 %v1402_v0, %v1401_v49  ;;  %v1299_v47 = vadd.f32 %v1298_v38, %v1297_v46  ;;  %v1364_v1 = vmul.f32 %v3262_v29, %v3262_v29  ;;  %v1302_v24 = vsel %vm652_vm1, %v3262_v29, 0.0 }
 0x22d   : > { %v1300_v58 = vsel %vm652_vm1, %v3272_v23, 0.0  ;;  %v1363_v59 = vmul.f32 %v3272_v23, %v3272_v23 }
 0x22e   : > { %v1301_v41 = vadd.f32 %v1300_v58, %v1299_v47  ;;  %v1405_v61 = vadd.f32 %v1404_v22, %v1403_v53  ;;  %v1408_v35 = vsel %vm652_vm1, %v1364_v1, 0.0 }
 0x22f   : > { %v1406_v40 = vsel %vm652_vm1, %v1363_v59, 0.0 }
 0x230   : > { %v1303_v4 = vadd.f32 %v1302_v24, %v1301_v41  ;;  %v1407_v6 = vadd.f32 %v1406_v40, %v1405_v61 }
 0x232   : > { %v1305_v63 = vadd.f32 %v1304_v32, %v1303_v4  ;;  %v1409_v56 = vadd.f32 %v1408_v35, %v1407_v6  ;;  %v2376_v36 = vpop.f32.mrb[2].mxu1 }
 0x233   : > { %v3299_v14 = vadd.f32 %v2376_v36, %v3163_v5  ;;  %v1198_v15 = vpop.f32.mrb[3].mxu1 }
 0x234   : > { %v1307_v18 = vadd.f32 %v1306_v9, %v1305_v63  ;;  %v1411_v54 = vadd.f32 %v1410_v19, %v1409_v56  ;;  %v3302_v57 = vadd.f32 %v3163_v5, %v1198_v15 }
 0x235   : > { %v1315_v20 = vsel %vm652_vm1, %v3299_v14, 0.0  ;;  %v1368_v51 = vmul.f32 %v3299_v14, %v3299_v14 }
 0x236   : > { %v1308_v10 = vrot.slane %v1307_v18, 4  ;;  %v1413_v48 = vadd.f32 %v1412_v27, %v1411_v54  ;;  %v1314_v55 = vsel %vm652_vm1, %v3302_v57, 0.0  ;;  %v1367_v28 = vmul.f32 %v3302_v57, %v3302_v57  ;;  %v2379_v30 = vpop.f32.mrb[4].mxu1 }
 0x237   : > { %v1421_v31 = vsel %vm652_vm1, %v1368_v51, 0.0  ;;  %v1316_v33 = vadd.f32 %v1315_v20, %v1314_v55  ;;  %v3315_v34 = vadd.f32 %v2379_v30, %v3163_v5  ;;  %v1208_v37 = vpop.f32.mrb[5].mxu1 }
 0x238   : > { %v1309_v39 = vadd.f32 %v1308_v10, %v1307_v18  ;;  %v1414_v50 = vrot.slane %v1413_v48, 4  ;;  %v1420_v45 = vsel %vm652_vm1, %v1367_v28, 0.0  ;;  %v3319_v12 = vadd.f32 %v3163_v5, %v1208_v37 }
 0x239   : > { %v1422_v46 = vadd.f32 %v1421_v31, %v1420_v45  ;;  %v1370_v49 = vmul.f32 %v3315_v34, %v3315_v34  ;;  %v1319_v22 = vsel %vm652_vm1, %v3315_v34, 0.0 }
 0x23a   : > { %v1310_v43 = vrot.slane %v1309_v39, 2  ;;  %v1415_v38 = vadd.f32 %v1414_v50, %v1413_v48  ;;  %v1317_v0 = vsel %vm652_vm1, %v3319_v12, 0.0  ;;  %v1369_v53 = vmul.f32 %v3319_v12, %v3319_v12  ;;  %v2382_v47 = vpop.f32.mrb[6].mxu1 }
 0x23b   : > { %v1318_v1 = vadd.f32 %v1317_v0, %v1316_v33  ;;  %v3330_v58 = vadd.f32 %v2382_v47, %v3163_v5  ;;  %v1218_v59 = vpop.f32.mrb[7].mxu1  ;;  %v1425_v40 = vsel %vm652_vm1, %v1370_v49, 0.0 }
 0x23c   : > { %v1311_v41 = vadd.f32 %v1310_v43, %v1309_v39  ;;  %v1416_v61 = vrot.slane %v1415_v38, 2  ;;  %v1423_v3 = vsel %vm652_vm1, %v1369_v53, 0.0  ;;  %v3334_v24 = vadd.f32 %v3163_v5, %v1218_v59 }
 0x23d   : > { %v1424_v4 = vadd.f32 %v1423_v3, %v1422_v46  ;;  %v1372_v6 = vmul.f32 %v3330_v58, %v3330_v58  ;;  %v1320_v7 = vadd.f32 %v1319_v22, %v1318_v1  ;;  %v1323_v9 = vsel %vm652_vm1, %v3330_v58, 0.0 }
 0x23e   : > { %v1312_v32 = vrot.slane %v1311_v41, 1  ;;  %v1417_v35 = vadd.f32 %v1416_v61, %v1415_v38  ;;  %v1321_v63 = vsel %vm652_vm1, %v3334_v24, 0.0  ;;  %v1371_v56 = vmul.f32 %v3334_v24, %v3334_v24  ;;  %v2385_v36 = vpop.f32.mrb[8].mxu1 }
 0x23f   : > { %v1322_v19 = vadd.f32 %v1321_v63, %v1320_v7  ;;  %v1426_v15 = vadd.f32 %v1425_v40, %v1424_v4  ;;  %v3346_v18 = vadd.f32 %v2385_v36, %v3163_v5  ;;  %v1228_v54 = vpop.f32.mrb[9].mxu1  ;;  %v1429_v48 = vsel %vm652_vm1, %v1372_v6, 0.0 }
 0x240   : > { %v1313_v27 = vadd.f32 %v1312_v32, %v1311_v41  ;;  %v1418_v20 = vrot.slane %v1417_v35, 1  ;;  %v1427_v51 = vsel %vm652_vm1, %v1371_v56, 0.0  ;;  %v3350_v10 = vadd.f32 %v3163_v5, %v1228_v54 }
 0x241   : > { %v1428_v55 = vadd.f32 %v1427_v51, %v1426_v15  ;;  %v1374_v28 = vmul.f32 %v3346_v18, %v3346_v18  ;;  %v1324_v30 = vadd.f32 %v1323_v9, %v1322_v19  ;;  %v1327_v47 = vsel %vm652_vm1, %v3346_v18, 0.0 }
 0x242   : > { %v1419_v31 = vadd.f32 %v1418_v20, %v1417_v35  ;;  %v3355_v33 = vmul.f32 0.0078125, %v1313_v27  ;;  %v1325_v37 = vsel %vm652_vm1, %v3350_v10, 0.0  ;;  %v1373_v39 = vmul.f32 %v3350_v10, %v3350_v10  ;;  %v2388_v50 = vpop.f32.mrb[10].mxu1 }
 0x243   : > { %v1326_v45 = vadd.f32 %v1325_v37, %v1324_v30  ;;  %v1430_v46 = vadd.f32 %v1429_v48, %v1428_v55  ;;  %v3362_v49 = vadd.f32 %v2388_v50, %v3163_v5  ;;  %v1238_v43 = vpop.f32.mrb[11].mxu1  ;;  %v1433_v41 = vsel %vm652_vm1, %v1374_v28, 0.0 }
 0x244   : > { %v1459_v38 = vmul.f32 0.0078125, %v1419_v31  ;;  %v1461_v0 = vmul.f32 %v3355_v33, %v3355_v33  ;;  %v1431_v53 = vsel %vm652_vm1, %v1373_v39, 0.0  ;;  %v3370_v1 = vadd.f32 %v3163_v5, %v1238_v43 }
 0x245   : > { %v1432_v22 = vadd.f32 %v1431_v53, %v1430_v46  ;;  %v1376_v61 = vmul.f32 %v3362_v49, %v3362_v49  ;;  %v1328_v3 = vadd.f32 %v1327_v47, %v1326_v45  ;;  %v1331_v9 = vsel %vm652_vm1, %v3362_v49, 0.0 }
 0x246   : > { %v1463_v59 = vsub.f32 %v1459_v38, %v1461_v0  ;;  %v2391_v40 = vpop.f32.mrb[12].mxu1  ;;  %v1329_v4 = vsel %vm652_vm1, %v3370_v1, 0.0  ;;  %v1375_v6 = vmul.f32 %v3370_v1, %v3370_v1 }
 0x247   : > { %v1434_v7 = vadd.f32 %v1433_v41, %v1432_v22  ;;  %v1248_v32 = vpop.f32.mrb[13].mxu1  ;;  %v1330_v63 = vadd.f32 %v1329_v4, %v1328_v3  ;;  %v3380_v56 = vadd.f32 %v2391_v40, %v3163_v5  ;;  %v1437_v15 = vsel %vm652_vm1, %v1376_v61, 0.0 }
 0x248   : > { %v1465_v35 = vadd.f32 1e-05, %v1463_v59  ;;  %v3383_v36 = vadd.f32 %v3163_v5, %v1248_v32  ;;  %v1435_v19 = vsel %vm652_vm1, %v1375_v6, 0.0 }
 0x249   : > { %v1436_v54 = vadd.f32 %v1435_v19, %v1434_v7  ;;  %v1378_v27 = vmul.f32 %v3380_v56, %v3380_v56  ;;  %v1332_v51 = vadd.f32 %v1331_v9, %v1330_v63  ;;  %v1335_v45 = vsel %vm652_vm1, %v3380_v56, 0.0 }
 0x24a   : > { %2535 = vrsqrt.f32 %v1465_v35  ;;  %v2394_v20 = vpop.f32.mrb[14].mxu1  ;;  %v1333_v48 = vsel %vm652_vm1, %v3383_v36, 0.0  ;;  %v1377_v55 = vmul.f32 %v3383_v36, %v3383_v36  ;;  %v1469_v9 = vsub.f32 0.0, %v3355_v33 }
 0x24b   : > { %v3396_v28 = vadd.f32 %v2394_v20, %v3163_v5  ;;  %v1258_v30 = vpop.f32.mrb[15].mxu1  ;;  %v1438_v31 = vadd.f32 %v1437_v15, %v1436_v54  ;;  %v1334_v39 = vadd.f32 %v1333_v48, %v1332_v51  ;;  %v1441_v53 = vsel %vm652_vm1, %v1378_v27, 0.0 }
 0x24c   : > { %v3399_v37 = vadd.f32 %v3163_v5, %v1258_v30  ;;  %v1439_v50 = vsel %vm652_vm1, %v1377_v55, 0.0 }
 0x24d   : > { %v1440_v46 = vadd.f32 %v1439_v50, %v1438_v31  ;;  %v1380_v47 = vmul.f32 %v3396_v28, %v3396_v28  ;;  %v1336_v22 = vadd.f32 %v1335_v45, %v1334_v39  ;;  %v1339_v7 = vsel %vm652_vm1, %v3396_v28, 0.0 }
 0x24e   : > { %v1337_v43 = vsel %vm652_vm1, %v3399_v37, 0.0  ;;  %v1379_v38 = vmul.f32 %v3399_v37, %v3399_v37  ;;  %v2397_v0 = vpop.f32.mrb[16].mxu1 }
 0x24f   : > { %v3412_v59 = vadd.f32 %v2397_v0, %v3163_v5  ;;  %v1268_v41 = vpop.f32.mrb[17].mxu1  ;;  %v1442_v61 = vadd.f32 %v1441_v53, %v1440_v46  ;;  %v1338_v4 = vadd.f32 %v1337_v43, %v1336_v22  ;;  %v1445_v19 = vsel %vm652_vm1, %v1380_v47, 0.0 }
 0x250   : > { %v1443_v3 = vsel %vm652_vm1, %v1379_v38, 0.0  ;;  %v3416_v40 = vadd.f32 %v3163_v5, %v1268_v41 }
 0x251   : > { %v1382_v6 = vmul.f32 %v3412_v59, %v3412_v59  ;;  %v1444_v32 = vadd.f32 %v1443_v3, %v1442_v61  ;;  %v1340_v5 = vadd.f32 %v1339_v7, %v1338_v4  ;;  %v1343_v54 = vsel %vm652_vm1, %v3412_v59, 0.0 }
 0x252   : > { %v1341_v35 = vsel %vm652_vm1, %v3416_v40, 0.0  ;;  %v1381_v63 = vmul.f32 %v3416_v40, %v3416_v40 }
 0x253   : > { %v1449_v27 = vsel %vm652_vm1, %v1382_v6, 0.0  ;;  %v1446_v20 = vadd.f32 %v1445_v19, %v1444_v32  ;;  %v1342_v30 = vadd.f32 %v1341_v35, %v1340_v5 }
 0x254   : > { %v2536_v15 = vpop.eup %2535  ;;  %v1447_v51 = vsel %vm652_vm1, %v1381_v63, 0.0 }
 0x255   : > { %v1471_v48 = vmul.f32 %v2536_v15, %v1469_v9  ;;  %v1485_v55 = vmul.f32 %v2536_v15, %v3272_v23  ;;  %v1473_v31 = vmul.f32 %v2536_v15, %v3171_v21  ;;  %v1448_v39 = vadd.f32 %v1447_v51, %v1446_v20 }
 0x256   : > { %v1474_v33 = vmul.f32 %v2536_v15, %v3166_v52  ;;  %v1475_v50 = vmul.f32 %v2536_v15, %v3189_v44  ;;  %v1476_v45 = vmul.f32 %v2536_v15, %v3186_v42  ;;  %v1344_v43 = vadd.f32 %v1343_v54, %v1342_v30 }
 0x257   : > { %v3437_v46 = vadd.f32 %v1485_v55, %v1471_v48  ;;  %v1505_v38 = vadd.f32 %v1473_v31, %v1471_v48  ;;  %v1477_v0 = vmul.f32 %v2536_v15, %v3204_v2  ;;  %v1450_v53 = vadd.f32 %v1449_v27, %v1448_v39 }
 0x258   : > { %v1506_v47 = vadd.f32 %v1474_v33, %v1471_v48  ;;  %v1507_v22 = vadd.f32 %v1475_v50, %v1471_v48  ;;  %v1508_v23 = vadd.f32 %v1476_v45, %v1471_v48  ;;  %v1345_v41 = vrot.slane %v1344_v43, 4 }
 0x259   : > { %v1537_v61 = vmax.f32 %v1505_v38, 0.0  ;;  %v1509_v21 = vadd.f32 %v1477_v0, %v1471_v48  ;;  %v1478_v3 = vmul.f32 %v2536_v15, %v3198_v8  ;;  %v1451_v52 = vrot.slane %v1450_v53, 4 }
 0x25a   : > { %v1538_v4 = vmax.f32 %v1506_v47, 0.0  ;;  %v1346_v44 = vadd.f32 %v1345_v41, %v1344_v43  ;;  %v1539_v42 = vmax.f32 %v1507_v22, 0.0  ;;  %v1479_v7 = vmul.f32 %v2536_v15, %v3220_v13 }
 0x25b   : > { %2406 = vmatprep.mubr.msk.f32.mxu1 %vm652_vm1, %v1537_v61  ;;  %v1510_v6 = vadd.f32 %v1478_v3, %v1471_v48  ;;  %v1452_v32 = vadd.f32 %v1451_v52, %v1450_v53  ;;  %v1480_v2 = vmul.f32 %v2536_v15, %v3214_v60  ;;  %v1481_v35 = vmul.f32 %v2536_v15, %v3236_v16 }
 0x25c   : > { %2407 = vmatmul.mubr.msk.f32.vlgmr.msra.gmra.mrb[18].mxu1 %vm652_vm1, %v1538_v4  ;;  %v1482_v63 = vmul.f32 %v2536_v15, %v3230_v11  ;;  %v1347_v9 = vrot.slane %v1346_v44, 2  ;;  %v1540_v8 = vmax.f32 %v1508_v23, 0.0  ;;  %v1511_v19 = vadd.f32 %v1479_v7, %v1471_v48 }
 0x25d   : > { %2409 = vmatprep.mubr.msk.f32.mxu1 %vm652_vm1, %v1539_v42  ;;  %v1483_v5 = vmul.f32 %v2536_v15, %v3252_v62  ;;  %v1453_v54 = vrot.slane %v1452_v32, 2  ;;  %v1512_v27 = vadd.f32 %v1480_v2, %v1471_v48  ;;  %v1513_v20 = vadd.f32 %v1481_v35, %v1471_v48 }
 0x25e   : > { %v1514_v13 = vadd.f32 %v1482_v63, %v1471_v48  ;;  %v1348_v51 = vadd.f32 %v1347_v9, %v1346_v44  ;;  %v1541_v55 = vmax.f32 %v1509_v21, 0.0  ;;  %v1484_v60 = vmul.f32 %v2536_v15, %v3246_v25 }
 0x25f   : > { %v1515_v30 = vadd.f32 %v1483_v5, %v1471_v48  ;;  %v1454_v31 = vadd.f32 %v1453_v54, %v1452_v32  ;;  %v1542_v16 = vmax.f32 %v1510_v6, 0.0  ;;  %v1486_v62 = vmul.f32 %v2536_v15, %v3262_v29 }
 0x260   : > { %2410 = vmatmul.mubr.msk.f32.gmra.mrb[20].mxu1 %vm652_vm1, %v1540_v8  ;;  %v1349_v11 = vrot.slane %v1348_v51, 1  ;;  %v1516_v39 = vadd.f32 %v1484_v60, %v1471_v48  ;;  %v1487_v50 = vmul.f32 %v2536_v15, %v3266_v26  ;;  %v1488_v45 = vmul.f32 %v2536_v15, %v3276_v17 }
 0x261   : > { %2412 = vmatprep.mubr.msk.f32.mxu1 %vm652_vm1, %v1541_v55  ;;  %v1455_v33 = vrot.slane %v1454_v31, 1  ;;  %v1543_v38 = vmax.f32 %v1511_v19, 0.0  ;;  %v1518_v25 = vadd.f32 %v1486_v62, %v1471_v48  ;;  %v1544_v41 = vmax.f32 %v1512_v27, 0.0 }
 0x262   : > { %v1350_v43 = vadd.f32 %v1349_v11, %v1348_v51  ;;  %v1519_v53 = vadd.f32 %v1487_v50, %v1471_v48  ;;  %v1520_v47 = vadd.f32 %v1488_v45, %v1471_v48  ;;  %v1545_v21 = vmax.f32 %v1513_v20, 0.0 }
 0x263   : > { %v1456_v0 = vadd.f32 %v1455_v33, %v1454_v31  ;;  %v1546_v26 = vmax.f32 %v1514_v13, 0.0  ;;  %v1547_v15 = vmax.f32 %v1515_v30, 0.0  ;;  %v1548_v48 = vmax.f32 %v1516_v39, 0.0 }
 0x264   : > { %2413 = vmatmul.mubr.msk.f32.gmra.mrb[22].mxu1 %vm652_vm1, %v1542_v16  ;;  %v1458_v22 = vmul.f32 0.0078125, %v1350_v43  ;;  %v1549_v3 = vmax.f32 %v3437_v46, 0.0  ;;  %v1550_v52 = vmax.f32 %v1518_v25, 0.0  ;;  %v1551_v4 = vmax.f32 %v1519_v53, 0.0 }
 0x265   : > { %2415 = vmatprep.mubr.msk.f32.mxu1 %vm652_vm1, %v1543_v38  ;;  %v1460_v23 = vmul.f32 0.0078125, %v1456_v0  ;;  %v1552_v42 = vmax.f32 %v1520_v47, 0.0 }
 0x266   : > { %v1462_v61 = vmul.f32 %v1458_v22, %v1458_v22  ;;  %v1470_v44 = vsub.f32 0.0, %v1458_v22 }
 0x268   : > { %2416 = vmatmul.mubr.msk.f32.gmra.mrb[24].mxu1 %vm652_vm1, %v1544_v41  ;;  %v1464_v29 = vsub.f32 %v1460_v23, %v1462_v61  ;;  %v3502_v23 = vld [vmem:[%s3592_s6] ss:$0 sm:$0xff] }
 0x269   : > { %2418 = vmatprep.mubr.msk.f32.mxu1 %vm652_vm1, %v1545_v21 }
 0x26a   : > { %v1466_v17 = vadd.f32 1e-05, %v1464_v29 }
 0x26c   : > { %2419 = vmatmul.mubr.msk.f32.gmra.mrb[26].mxu1 %vm652_vm1, %v1546_v26  ;;  %2537 = vrsqrt.f32 %v1466_v17 }
 0x26d   : > { %2421 = vmatprep.mubr.msk.f32.mxu1 %vm652_vm1, %v1547_v15 }
 0x270   : > { %2422 = vmatmul.mubr.msk.f32.gmra.mrb[28].mxu1 %vm652_vm1, %v1548_v48 }
 0x271   : > { %2424 = vmatprep.mubr.msk.f32.mxu1 %vm652_vm1, %v1549_v3 }
 0x274   : > { %2425 = vmatmul.mubr.msk.f32.gmra.mrb[30].mxu1 %vm652_vm1, %v1550_v52 }
 0x275   : > { %2427 = vmatprep.mubr.msk.f32.mxu1 %vm652_vm1, %v1551_v4 }
 0x276   : > { %v2538_v6 = vpop.eup %2537 }
 0x277   : > { %v1472_v7 = vmul.f32 %v2538_v6, %v1470_v44  ;;  %v1503_v32 = vmul.f32 %v2538_v6, %v3416_v40  ;;  %v1489_v46 = vmul.f32 %v2538_v6, %v3302_v57  ;;  %v1490_v2 = vmul.f32 %v2538_v6, %v3299_v14 }
 0x278   : > { %2428 = vmatmul.mubr.msk.f32.gmra.mrb[32].mxu1 %vm652_vm1, %v1552_v42  ;;  %v1491_v35 = vmul.f32 %v2538_v6, %v3319_v12  ;;  %v1492_v63 = vmul.f32 %v2538_v6, %v3315_v34  ;;  %v1493_v9 = vmul.f32 %v2538_v6, %v3334_v24  ;;  %v1494_v8 = vmul.f32 %v2538_v6, %v3330_v58 }
 0x279   : > { %v1535_v19 = vadd.f32 %v1503_v32, %v1472_v7  ;;  %v1521_v5 = vadd.f32 %v1489_v46, %v1472_v7  ;;  %v1522_v54 = vadd.f32 %v1490_v2, %v1472_v7  ;;  %v1495_v27 = vmul.f32 %v2538_v6, %v3350_v10 }
 0x27a   : > { %v1523_v40 = vadd.f32 %v1491_v35, %v1472_v7  ;;  %v1524_v20 = vadd.f32 %v1492_v63, %v1472_v7  ;;  %v1525_v13 = vadd.f32 %v1493_v9, %v1472_v7  ;;  %v1526_v51 = vadd.f32 %v1494_v8, %v1472_v7 }
 0x27b   : > { %v1553_v57 = vmax.f32 %v1521_v5, 0.0  ;;  %v1554_v55 = vmax.f32 %v1522_v54, 0.0  ;;  %v1527_v14 = vadd.f32 %v1495_v27, %v1472_v7  ;;  %v1496_v12 = vmul.f32 %v2538_v6, %v3346_v18 }
 0x27c   : > { %v1555_v34 = vmax.f32 %v1523_v40, 0.0  ;;  %v1497_v58 = vmul.f32 %v2538_v6, %v3370_v1  ;;  %v1498_v30 = vmul.f32 %v2538_v6, %v3362_v49  ;;  %v1499_v10 = vmul.f32 %v2538_v6, %v3383_v36 }
 0x27d   : > { %2430 = vmatprep.mubr.msk.f32.mxu1 %vm652_vm1, %v1553_v57  ;;  %v1528_v24 = vadd.f32 %v1496_v12, %v1472_v7  ;;  %v1500_v60 = vmul.f32 %v2538_v6, %v3380_v56  ;;  %v1501_v31 = vmul.f32 %v2538_v6, %v3399_v37  ;;  %v1502_v11 = vmul.f32 %v2538_v6, %v3396_v28 }
 0x27e   : > { %2431 = vmatmul.mubr.msk.f32.gmra.mrb[34].mxu1 %vm652_vm1, %v1554_v55  ;;  %v1556_v18 = vmax.f32 %v1524_v20, 0.0  ;;  %v1529_v16 = vadd.f32 %v1497_v58, %v1472_v7  ;;  %v1530_v39 = vadd.f32 %v1498_v30, %v1472_v7  ;;  %v1531_v33 = vadd.f32 %v1499_v10, %v1472_v7 }
 0x27f   : > { %2433 = vmatprep.mubr.msk.f32.mxu1 %vm652_vm1, %v1555_v34  ;;  %v1532_v62 = vadd.f32 %v1500_v60, %v1472_v7  ;;  %v1533_v1 = vadd.f32 %v1501_v31, %v1472_v7  ;;  %v1534_v50 = vadd.f32 %v1502_v11, %v1472_v7  ;;  %v1557_v49 = vmax.f32 %v1525_v13, 0.0 }
 0x280   : > { %v1504_v45 = vmul.f32 %v2538_v6, %v3412_v59  ;;  %v1558_v36 = vmax.f32 %v1526_v51, 0.0  ;;  %v1559_v37 = vmax.f32 %v1527_v14, 0.0  ;;  %v1560_v28 = vmax.f32 %v1528_v24, 0.0 }
 0x281   : > { %v1561_v43 = vmax.f32 %v1529_v16, 0.0  ;;  %v1562_v38 = vmax.f32 %v1530_v39, 0.0  ;;  %v1563_v0 = vmax.f32 %v1531_v33, 0.0  ;;  %v1564_v59 = vmax.f32 %v1532_v62, 0.0 }
 0x282   : > { %2434 = vmatmul.mubr.msk.f32.gmra.mrb[36].mxu1 %vm652_vm1, %v1556_v18  ;;  %v1536_v56 = vadd.f32 %v1504_v45, %v1472_v7  ;;  %v1565_v25 = vmax.f32 %v1533_v1, 0.0  ;;  %v1566_v53 = vmax.f32 %v1534_v50, 0.0  ;;  %v1567_v47 = vmax.f32 %v1535_v19, 0.0 }
 0x283   : > { %2436 = vmatprep.mubr.msk.f32.mxu1 %vm652_vm1, %v1557_v49 }
 0x284   : > { %v1568_v22 = vmax.f32 %v1536_v56, 0.0 }
 0x286   : > { %2437 = vmatmul.mubr.msk.f32.gmra.mrb[38].mxu1 %vm652_vm1, %v1558_v36 }
 0x287   : > { %2439 = vmatprep.mubr.msk.f32.mxu1 %vm652_vm1, %v1559_v37 }
 0x28a   : > { %2440 = vmatmul.mubr.msk.f32.gmra.mrb[40].mxu1 %vm652_vm1, %v1560_v28 }
 0x28b   : > { %2442 = vmatprep.mubr.msk.f32.mxu1 %vm652_vm1, %v1561_v43 }
 0x28e   : > { %2443 = vmatmul.mubr.msk.f32.gmra.mrb[42].mxu1 %vm652_vm1, %v1562_v38 }
 0x28f   : > { %2445 = vmatprep.mubr.msk.f32.mxu1 %vm652_vm1, %v1563_v0 }
 0x292   : > { %2446 = vmatmul.mubr.msk.f32.gmra.mrb[44].mxu1 %vm652_vm1, %v1564_v59 }
 0x293   : > { %2448 = vmatprep.mubr.msk.f32.mxu1 %vm652_vm1, %v1565_v25 }
 0x296   : > { %2449 = vmatmul.mubr.msk.f32.gmra.mrb[46].mxu1 %vm652_vm1, %v1566_v53 }
 0x297   : > { %2451 = vmatprep.mubr.msk.f32.mxu1 %vm652_vm1, %v1567_v47 }
 0x29a   : > { %2452 = vmatmul.mubr.msk.f32.gmra.mrb[48].mxu1 %vm652_vm1, %v1568_v22 }
 0x32f   : > { %v2408_v41 = vpop.f32.mrb[18].mxu1 }
 0x330   : > { %v1742_v61 = vpop.f32.mrb[19].mxu1  ;;  %v1748_v17 = vadd.f32 %v2408_v41, %v3502_v23 }
 0x331   : > { %v1743_v21 = vadd.f32 %v3502_v23, %v1742_v61 }
 0x333   : > { %v2411_v29 = vpop.f32.mrb[20].mxu1  ;;  %1901 = vxpose.xlu0.b32.start [1/16] (narrow) %v1743_v21, 32 }
 0x334   : > { %v1752_v26 = vpop.f32.mrb[21].mxu1  ;;  %v1758_v44 = vadd.f32 %v2411_v29, %v3502_v23 }
 0x335   : > { %v1753_v3 = vadd.f32 %v3502_v23, %v1752_v26 }
 0x337   : > { %v2414_v15 = vpop.f32.mrb[22].mxu1  ;;  %1902 = vxpose.xlu0.b32.cont [2/16] (narrow) %v1748_v17, 32 }
 0x338   : > { %v1762_v48 = vpop.f32.mrb[23].mxu1  ;;  %v1768_v2 = vadd.f32 %v2414_v15, %v3502_v23 }
 0x339   : > { %v1763_v7 = vadd.f32 %v3502_v23, %v1762_v48 }
 0x33b   : > { %v2417_v52 = vpop.f32.mrb[24].mxu1  ;;  %1903 = vxpose.xlu0.b32.cont [3/16] (narrow) %v1753_v3, 32 }
 0x33c   : > { %v1772_v4 = vpop.f32.mrb[25].mxu1  ;;  %v1778_v5 = vadd.f32 %v2417_v52, %v3502_v23 }
 0x33d   : > { %v1773_v9 = vadd.f32 %v3502_v23, %v1772_v4 }
 0x33f   : > { %v2420_v42 = vpop.f32.mrb[26].mxu1  ;;  %1904 = vxpose.xlu0.b32.cont [4/16] (narrow) %v1758_v44, 32 }
 0x340   : > { %v1782_v6 = vpop.f32.mrb[27].mxu1  ;;  %v1788_v13 = vadd.f32 %v2420_v42, %v3502_v23 }
 0x341   : > { %v1783_v54 = vadd.f32 %v3502_v23, %v1782_v6 }
 0x343   : > { %v2423_v32 = vpop.f32.mrb[28].mxu1  ;;  %1905 = vxpose.xlu0.b32.cont [5/16] (narrow) %v1763_v7, 32 }
 0x344   : > { %v1792_v46 = vpop.f32.mrb[29].mxu1  ;;  %v1798_v58 = vadd.f32 %v2423_v32, %v3502_v23 }
 0x345   : > { %v1793_v14 = vadd.f32 %v3502_v23, %v1792_v46 }
 0x347   : > { %v2426_v35 = vpop.f32.mrb[30].mxu1  ;;  %1906 = vxpose.xlu0.b32.cont [6/16] (narrow) %v1768_v2, 32 }
 0x348   : > { %v1802_v63 = vpop.f32.mrb[31].mxu1  ;;  %v1808_v62 = vadd.f32 %v2426_v35, %v3502_v23 }
 0x349   : > { %v1803_v31 = vadd.f32 %v3502_v23, %v1802_v63 }
 0x34b   : > { %v2429_v8 = vpop.f32.mrb[32].mxu1  ;;  %1907 = vxpose.xlu0.b32.cont [7/16] (narrow) %v1773_v9, 32 }
 0x34c   : > { %v1812_v19 = vpop.f32.mrb[33].mxu1  ;;  %v1818_v59 = vadd.f32 %v2429_v8, %v3502_v23 }
 0x34d   : > { %v1813_v36 = vadd.f32 %v3502_v23, %v1812_v19 }
 0x34f   : > { %1908 = vxpose.xlu0.b32.cont [8/16] (narrow) %v1778_v5, 32 }
 0x351   : > { %v2432_v27 = vpop.f32.mrb[34].mxu1 }
 0x352   : > { %v1822_v40 = vpop.f32.mrb[35].mxu1  ;;  %v1828_v55 = vadd.f32 %v2432_v27, %v3502_v23 }
 0x353   : > { %1909 = vxpose.xlu0.b32.cont [9/16] (narrow) %v1783_v54, 32  ;;  %v1823_v20 = vadd.f32 %v3502_v23, %v1822_v40 }
 0x355   : > { %v2435_v51 = vpop.f32.mrb[36].mxu1  ;;  %1933 = vxpose.xlu1.b32.start [1/16] (narrow) %v1823_v20, 32 }
 0x356   : > { %v1832_v57 = vpop.f32.mrb[37].mxu1  ;;  %v1838_v60 = vadd.f32 %v2435_v51, %v3502_v23 }
 0x357   : > { %1910 = vxpose.xlu0.b32.cont [10/16] (narrow) %v1788_v13, 32  ;;  %v1833_v24 = vadd.f32 %v3502_v23, %v1832_v57 }
 0x359   : > { %v2438_v12 = vpop.f32.mrb[38].mxu1  ;;  %1934 = vxpose.xlu1.b32.cont [2/16] (narrow) %v1828_v55, 32 }
 0x35a   : > { %v1842_v34 = vpop.f32.mrb[39].mxu1  ;;  %v1848_v45 = vadd.f32 %v2438_v12, %v3502_v23 }
 0x35b   : > { %1911 = vxpose.xlu0.b32.cont [11/16] (narrow) %v1793_v14, 32  ;;  %v1843_v39 = vadd.f32 %v3502_v23, %v1842_v34 }
 0x35d   : > { %v2441_v30 = vpop.f32.mrb[40].mxu1  ;;  %1935 = vxpose.xlu1.b32.cont [3/16] (narrow) %v1833_v24, 32 }
 0x35e   : > { %v1852_v10 = vpop.f32.mrb[41].mxu1  ;;  %v1858_v22 = vadd.f32 %v2441_v30, %v3502_v23 }
 0x35f   : > { %1912 = vxpose.xlu0.b32.cont [12/16] (narrow) %v1798_v58, 32  ;;  %v1853_v38 = vadd.f32 %v3502_v23, %v1852_v10 }
 0x361   : > { %v2444_v11 = vpop.f32.mrb[42].mxu1  ;;  %1936 = vxpose.xlu1.b32.cont [4/16] (narrow) %v1838_v60, 32 }
 0x362   : > { %v1868_v18 = vadd.f32 %v2444_v11, %v3502_v23  ;;  %v1862_v16 = vpop.f32.mrb[43].mxu1 }
 0x363   : > { %1913 = vxpose.xlu0.b32.cont [13/16] (narrow) %v1803_v31, 32  ;;  %v1863_v33 = vadd.f32 %v3502_v23, %v1862_v16 }
 0x365   : > { %v2447_v1 = vpop.f32.mrb[44].mxu1  ;;  %1937 = vxpose.xlu1.b32.cont [5/16] (narrow) %v1843_v39, 32 }
 0x366   : > { %v1878_v50 = vadd.f32 %v2447_v1, %v3502_v23  ;;  %v1872_v49 = vpop.f32.mrb[45].mxu1 }
 0x367   : > { %1914 = vxpose.xlu0.b32.cont [14/16] (narrow) %v1808_v62, 32  ;;  %v1873_v56 = vadd.f32 %v3502_v23, %v1872_v49 }
 0x369   : > { %v2450_v37 = vpop.f32.mrb[46].mxu1  ;;  %1938 = vxpose.xlu1.b32.cont [6/16] (narrow) %v1848_v45, 32 }
 0x36a   : > { %v1888_v28 = vadd.f32 %v2450_v37, %v3502_v23  ;;  %v1882_v43 = vpop.f32.mrb[47].mxu1 }
 0x36b   : > { %1915 = vxpose.xlu0.b32.cont [15/16] (narrow) %v1813_v36, 32  ;;  %v1883_v0 = vadd.f32 %v3502_v23, %v1882_v43 }
 0x36d   : > { %v2453_v25 = vpop.f32.mrb[48].mxu1  ;;  %1939 = vxpose.xlu1.b32.cont [7/16] (narrow) %v1853_v38, 32 }
 0x36e   : > { %v1898_v53 = vadd.f32 %v2453_v25, %v3502_v23  ;;  %v1892_v47 = vpop.f32.mrb[49].mxu1 }
 0x36f   : > { %1916 = vxpose.xlu0.b32.end [16/16] (narrow) %v1818_v59, 32  ;;  %v1893_v41 = vadd.f32 %v3502_v23, %v1892_v47 }
 0x371   : > { %1940 = vxpose.xlu1.b32.cont [8/16] (narrow) %v1858_v22, 32 }
 0x375   : > { %1941 = vxpose.xlu1.b32.cont [9/16] (narrow) %v1863_v33, 32 }
 0x379   : > { %1942 = vxpose.xlu1.b32.cont [10/16] (narrow) %v1868_v18, 32 }
 0x37d   : > { %1943 = vxpose.xlu1.b32.cont [11/16] (narrow) %v1873_v56, 32 }
 0x381   : > { %1944 = vxpose.xlu1.b32.cont [12/16] (narrow) %v1878_v50, 32 }
 0x385   : > { %1945 = vxpose.xlu1.b32.cont [13/16] (narrow) %v1883_v0, 32 }
 0x389   : > { %1946 = vxpose.xlu1.b32.cont [14/16] (narrow) %v1888_v28, 32 }
 0x38d   : > { %1947 = vxpose.xlu1.b32.cont [15/16] (narrow) %v1893_v41, 32 }
 0x391   : > { %1948 = vxpose.xlu1.b32.end [16/16] (narrow) %v1898_v53, 32 }
 0x3b3   : > { %v1917_v61 = vpop.trf.xlu0 }
 0x3b4   : > { %1965 = vst [vmem:[%s274_s16] sm:$0xff] %v1917_v61 }
 0x3b7   : > { %v1918_v21 = vpop.trf.xlu0 }
 0x3b8   : > { %1966 = vst [vmem:[%s274_s16 + $0x8] sm:$0xff] %v1918_v21 }
 0x3bb   : > { %v1919_v29 = vpop.trf.xlu0 }
 0x3bc   : > { %1967 = vst [vmem:[%s274_s16 + $0x10] sm:$0xff] %v1919_v29 }
 0x3bf   : > { %v1920_v23 = vpop.trf.xlu0 }
 0x3c0   : > { %1968 = vst [vmem:[%s274_s16 + $0x18] sm:$0xff] %v1920_v23 }
 0x3d5   : > { %v1949_v26 = vpop.trf.xlu1 }
 0x3d6   : > { %1969 = vst [vmem:[%s274_s16 + $0x20] sm:$0xff] %v1949_v26 }
 0x3d9   : > { %v1950_v17 = vpop.trf.xlu1 }
 0x3da   : > { %1970 = vst [vmem:[%s274_s16 + $0x28] sm:$0xff] %v1950_v17 }
 0x3dd   : > { %v1951_v15 = vpop.trf.xlu1 }
 0x3de   : > { %1971 = vst [vmem:[%s274_s16 + $0x30] sm:$0xff] %v1951_v15 }
 0x3e1   : > { %v1952_v48 = vpop.trf.xlu1 }
 0x3e2   : > { %1972 = vst [vmem:[%s274_s16 + $0x38] sm:$0xff] %v1952_v48 }
 0x3e3   : > { %2552 = shalt.err (!%p2549_p3)
}
 0x3e4   : > { %s2553_s9 = scalar_lea.hbm %s3543_s21, 1024  ;;  %s2557_s15 = scalar_lea.hbm %s3593_s7, 2048 }
 0x3e5   : > { %p2554_p4 = scmp.ne.s32.totalorder %s3543_s21, %s2553_s9  ;;  %p2558_p9 = scmp.lt.u32.totalorder %s3543_s21, %s3593_s7 }
 0x3e6   : > { %p2559_p10 = scmp.lt.u32.totalorder %s2557_s15, %s2553_s9  ;;  %p2561_p12 = scmp.lt.u32.totalorder %s2553_s9, %s3543_s21 }
 0x3e7   : > { %p2555_p7 = pnand %p2554_p4, %p2684_p5 }
 0x3e8   : > { %p2560_p11 = por %p2559_p10, %p2558_p9 }
 0x3e9   : > { %p2556_p8 = pneg %p2555_p7 }
 0x3ea   : > { %p2562_p13 = por %p2561_p12, %p2560_p11 }
 0x3ec   : > { %p2563_p0 = pnand %p2562_p13, %p2556_p8 }
 0x3ee   : > { %2566 = shalt.err (!%p2563_p0)
}
 0x3ef   : > { %s2604_s20 = smov 128   ;;  %s2605_s19 = smov 8  }
 0x3f0   : > { %2490 = dma.vmem_to_hbm [thread:$0]  (%p2684_p5), %s3538_s17, 1024, %s3543_s21, %s3545_s22, %s2604_s20, %s2604_s20, %s2605_s19  }
 0x3f1 PF: > { %p2496_p1 = scmp.ge.s32.totalorder %s2601_s27, 2  ;;  %s2003_s23 = sand.u32 1, %s2589_s24  }
 0x3f2   : > { %s2004_s28 = scalar_lea.sflag [#allocation3], %s2003_s23 }
 0x3f3   : > { %p2493_p2 = pnand %p2496_p1, %p2688_p6 }
 0x3f5   : > { %2584 = dma.done.wait (!%p2493_p2), %s2004_s28, 1024  }
 0x3f6   : > { %2586 = vsyncadd (!%p2493_p2), %s2004_s28, 4294966272  ;;  %p17_p3 = scmp.ge.s32.totalorder %s2671_s30, 4   ;;  %s3596_s24 = smov %s2593_s25 }
 0x3f7   : > { %s3597_s25 = smov %s2597_s26  ;;  %s3598_s26 = smov %s2682_s10 }
 0x3f8   : > { %s3599_s27 = smov %s2671_s30  ;;  %19 = sbr.rel (!%p17_p3) target bundleno = 3 (0x3), region = 83 }
 0x3ff   :  { %2009 = vsyncpa [#allocation3], 1 }
 0x400   :  { %2011 = vsyncpa [#allocation3 + $0x1], 1 }

</bundles_post_ra>
